<compile_context>
chip_gen: v5e
topology: v5e:2x2
jax: 0.10.0
libtpu: 0.0.40
codegen_flags: <defaults>
</compile_context>

<pallas_src>
import functools

import jax
import jax.numpy as jnp
from jax.experimental import pallas as pl
from jax.experimental.pallas import tpu as pltpu


# ----------------------------------------------------------------------------
# Tile pickers (all shapes here are static Python ints).
# ----------------------------------------------------------------------------
def _pick_row_tile(m, pref=512):
    """Largest divisor of m that is <= pref and a multiple of 8 (or m itself)."""
    if m <= pref:
        return m
    for t in range(pref, 7, -8):
        if m % t == 0:
            return t
    return m


def _pick_vocab_tile(v, pref=2048):
    """Largest 128-multiple divisor of v that is <= pref (or v itself)."""
    if v <= pref:
        return v
    for t in range(pref, 127, -128):
        if v % t == 0:
            return t
    return v


def _pick_time_block(t, pref=32):
    """Largest divisor of t that is <= pref."""
    if t <= pref:
        return t
    for ts in range(pref, 0, -1):
        if t % ts == 0:
            return ts
    return 1


# ----------------------------------------------------------------------------
# Generic (X @ W + b) kernel: used for the hoisted input projection and for
# the final vocab-tiled linear head.  Inputs bf16, accumulation f32.
# ----------------------------------------------------------------------------
def _matmul_bias_kernel(x_ref, w_ref, b_ref, o_ref):
    o_ref[...] = (jnp.dot(x_ref[...], w_ref[...],
                          preferred_element_type=jnp.float32)
                  + b_ref[...]).astype(o_ref.dtype)


def input_projection(x2d, w_ih, bias):
    """x2d: (M, Din) bf16, w_ih: (Din, 4H) bf16, bias: (1, 4H) f32 -> (M, 4H) f32."""
    M, Din = x2d.shape
    G = w_ih.shape[1]
    TM = _pick_row_tile(M)
    return pl.pallas_call(
        _matmul_bias_kernel,
        out_shape=jax.ShapeDtypeStruct((M, G), jnp.float32),
        grid=(M // TM,),
        in_specs=[
            pl.BlockSpec((TM, Din), lambda i: (i, 0)),
            pl.BlockSpec((Din, G), lambda i: (0, 0)),
            pl.BlockSpec((1, G), lambda i: (0, 0)),
        ],
        out_specs=pl.BlockSpec((TM, G), lambda i: (i, 0)),
        compiler_params=pltpu.CompilerParams(
            dimension_semantics=("parallel",)),
    )(x2d, w_ih, bias)


def linear(x, w, b):
    """x: (B, H) bf16, w: (H, V) bf16, b: (1, V) f32 -> (B, V) f32, tiled over V."""
    B, H = x.shape
    V = w.shape[1]
    TV = _pick_vocab_tile(V)
    return pl.pallas_call(
        _matmul_bias_kernel,
        out_shape=jax.ShapeDtypeStruct((B, V), jnp.float32),
        grid=(V // TV,),
        in_specs=[
            pl.BlockSpec((B, H), lambda j: (0, 0)),
            pl.BlockSpec((H, TV), lambda j: (0, j)),
            pl.BlockSpec((1, TV), lambda j: (0, j)),
        ],
        out_specs=pl.BlockSpec((B, TV), lambda j: (0, j)),
        compiler_params=pltpu.CompilerParams(
            dimension_semantics=("parallel",)),
    )(x, w, b)


# ----------------------------------------------------------------------------
# Recurrence kernel: consumes precomputed input gates gx = X@W_ih + b and runs
# only the serial part (h_prev @ W_hh + gate nonlinearities).  Grid iterates
# over blocks of TS timesteps; h/c carried across blocks in f32 VMEM scratch.
# ----------------------------------------------------------------------------
def _lstm_recurrence_kernel(gx_ref, h0_ref, c0_ref, whh_ref,
                            y_ref, cn_ref, h_sc, c_sc):
    tb = pl.program_id(0)
    TS = gx_ref.shape[0]
    H = whh_ref.shape[0]

    @pl.when(tb == 0)
    def _():
        h_sc[...] = h0_ref[...]
        c_sc[...] = c0_ref[...]

    h = h_sc[...]                       # (B, H) f32 carry
    c = c_sc[...]                       # (B, H) f32 carry
    gx = gx_ref[...]                    # (TS, B, 4H) f32 precomputed x@W_ih + b
    whh = whh_ref[...]                  # (H, 4H) bf16

    hs = []
    for ts in range(TS):                # static unroll over the time block
        gates = gx[ts] + jnp.dot(h.astype(jnp.bfloat16), whh,
                                 preferred_element_type=jnp.float32)
        i_g = jax.nn.sigmoid(gates[:, 0 * H:1 * H])
        f_g = jax.nn.sigmoid(gates[:, 1 * H:2 * H])
        g_g = jnp.tanh(gates[:, 2 * H:3 * H])
        o_g = jax.nn.sigmoid(gates[:, 3 * H:4 * H])
        c = f_g * c + i_g * g_g
        h = o_g * jnp.tanh(c)
        hs.append(h)

    # Single dense store of the whole TS-block of hidden states (bf16).
    y_ref[...] = jnp.stack(hs, axis=0).astype(y_ref.dtype)
    h_sc[...] = h
    c_sc[...] = c

    @pl.when(tb == pl.num_programs(0) - 1)
    def _():
        cn_ref[...] = c


def lstm_recurrence(gx, h0, c0, w_hh):
    """gx: (T, B, 4H) f32, h0/c0: (B, H) f32, w_hh: (H, 4H) bf16.

    Returns (y_seq (T, B, H) bf16, c_n (B, H) f32).  h_n == y_seq[-1].
    """
    T, B, G = gx.shape
    H = h0.shape[1]
    TS = _pick_time_block(T)
    return pl.pallas_call(
        _lstm_recurrence_kernel,
        out_shape=(
            jax.ShapeDtypeStruct((T, B, H), jnp.bfloat16),
            jax.ShapeDtypeStruct((B, H), jnp.float32),
        ),
        grid=(T // TS,),
        in_specs=[
            pl.BlockSpec((TS, B, G), lambda t: (t, 0, 0)),    # precomputed gates
            pl.BlockSpec((B, H), lambda t: (0, 0)),           # h0
            pl.BlockSpec((B, H), lambda t: (0, 0)),           # c0
            pl.BlockSpec((H, G), lambda t: (0, 0)),           # W_hh (bf16)
        ],
        out_specs=(
            pl.BlockSpec((TS, B, H), lambda t: (t, 0, 0)),    # y sequence (bf16)
            pl.BlockSpec((B, H), lambda t: (0, 0)),           # c_n (resident)
        ),
        scratch_shapes=[
            pltpu.VMEM((B, H), jnp.float32),                  # h carry
            pltpu.VMEM((B, H), jnp.float32),                  # c carry
        ],
        compiler_params=pltpu.CompilerParams(
            dimension_semantics=("arbitrary",)),
    )(gx, h0, c0, w_hh)


# ----------------------------------------------------------------------------
# Model wrapper (glue: embedding gather, per-layer projection + recurrence).
# ----------------------------------------------------------------------------
@functools.partial(jax.jit, static_argnames=())
def lstm_text_generation_forward(params, x_ids, hidden):
    """Replicates LSTMTextGenerationModel.forward (multi_task=False, eval mode).

    x_ids: (B, T) int32 token ids.
    hidden: tuple (h0, c0), each (num_layers, B, H).
    Returns (logits (B, V) f32, None, (h_n, c_n)).
    """
    h0_all, c0_all = hidden
    num_layers = h0_all.shape[0]
    H = h0_all.shape[2]
    B, T = x_ids.shape

    # Embedding gather written directly in time-major (T, B, E) layout — no
    # materialized float transpose; bf16 activations for the MXU.
    emb_tm = jnp.take(params["embedding"], x_ids.T, axis=0)     # (T, B, E) f32
    layer_in = emb_tm.astype(jnp.bfloat16)

    hn_list, cn_list = [], []
    y_seq = layer_in
    for l in range(num_layers):
        wl = params["lstm"][l]
        Din = layer_in.shape[-1]
        # Phase 1: one big MXU matmul for all timesteps (hoisted input proj).
        gx = input_projection(layer_in.reshape(T * B, Din),
                              wl["w_ih"], wl["bias"])           # (T*B, 4H) f32
        gx = gx.reshape(T, B, 4 * H)
        # Phase 2: serial recurrence (only h_prev @ W_hh on the critical path).
        y_seq, c_n = lstm_recurrence(gx, h0_all[l], c0_all[l], wl["w_hh"])
        hn_list.append(y_seq[-1].astype(jnp.float32))           # h_n == y[-1]
        cn_list.append(c_n)
        # TODO(synk): inter-layer / post-LSTM dropout skipped — eval-mode identity.
        layer_in = y_seq                                        # bf16 inter-layer

    last_h = y_seq[-1]                                          # (B, H) bf16
    logits = linear(last_h, params["linear_w"], params["linear_b"])

    h_n = jnp.stack(hn_list, axis=0)
    c_n = jnp.stack(cn_list, axis=0)
    return logits, None, (h_n, c_n)


def init_params(key, vocab_size, embedding_dim, hidden_size, num_layers):
    keys = jax.random.split(key, 3 + 4 * num_layers)
    params = {
        "embedding": jax.random.normal(keys[0], (vocab_size, embedding_dim),
                                       jnp.float32) * 0.1,
        # MXU weights stored bf16; biases (added post-matmul) kept f32.
        "linear_w": (jax.random.normal(keys[1], (hidden_size, vocab_size),
                                       jnp.float32) * 0.1).astype(jnp.bfloat16),
        "linear_b": jax.random.normal(keys[2], (1, vocab_size),
                                      jnp.float32) * 0.1,
        "lstm": [],
    }
    for l in range(num_layers):
        din = embedding_dim if l == 0 else hidden_size
        k = keys[3 + 4 * l: 3 + 4 * (l + 1)]
        # PyTorch stores W_ih as (4H, Din); we keep the transpose (Din, 4H),
        # gate order (i, f, g, o), and fold b_ih + b_hh into one bias row.
        w_ih = (jax.random.normal(k[0], (din, 4 * hidden_size),
                                  jnp.float32) * 0.1).astype(jnp.bfloat16)
        w_hh = (jax.random.normal(k[1], (hidden_size, 4 * hidden_size),
                                  jnp.float32) * 0.1).astype(jnp.bfloat16)
        b_ih = jax.random.normal(k[2], (4 * hidden_size,), jnp.float32) * 0.1
        b_hh = jax.random.normal(k[3], (4 * hidden_size,), jnp.float32) * 0.1
        params["lstm"].append({
            "w_ih": w_ih,
            "w_hh": w_hh,
            "bias": (b_ih + b_hh).reshape(1, 4 * hidden_size),
        })
    return params


# ----------------------------------------------------------------------------
# Pure-JAX f32 reference (weights upcast) for a sanity check.
# ----------------------------------------------------------------------------
def _reference_forward(params, x_ids, hidden):
    h0_all, c0_all = hidden
    num_layers = h0_all.shape[0]
    H = h0_all.shape[2]
    emb = jnp.take(params["embedding"], x_ids, axis=0)          # (B, T, E)
    layer_in = emb
    hn_list, cn_list = [], []
    for l in range(num_layers):
        wl = params["lstm"][l]
        w_ih = wl["w_ih"].astype(jnp.float32)
        w_hh = wl["w_hh"].astype(jnp.float32)
        h, c = h0_all[l], c0_all[l]
        outs = []
        for t in range(layer_in.shape[1]):
            g = layer_in[:, t, :] @ w_ih + h @ w_hh + wl["bias"]
            i_g = jax.nn.sigmoid(g[:, 0 * H:1 * H])
            f_g = jax.nn.sigmoid(g[:, 1 * H:2 * H])
            g_g = jnp.tanh(g[:, 2 * H:3 * H])
            o_g = jax.nn.sigmoid(g[:, 3 * H:4 * H])
            c = f_g * c + i_g * g_g
            h = o_g * jnp.tanh(c)
            outs.append(h)
        layer_in = jnp.stack(outs, axis=1)
        hn_list.append(h)
        cn_list.append(c)
    logits = (layer_in[:, -1, :] @ params["linear_w"].astype(jnp.float32)
              + params["linear_b"])
    return logits, (jnp.stack(hn_list, 0), jnp.stack(cn_list, 0))


if __name__ == "__main__":
    vocab_size, embedding_dim, hidden_size, num_layers = 64, 16, 32, 2
    batch, seq = 2, 8

    key = jax.random.PRNGKey(0)
    pkey, xkey = jax.random.split(key)
    params = init_params(pkey, vocab_size, embedding_dim, hidden_size, num_layers)

    x_ids = jax.random.randint(xkey, (batch, seq), 0, vocab_size, dtype=jnp.int32)
    h0 = jnp.zeros((num_layers, batch, hidden_size), jnp.float32)
    c0 = jnp.zeros((num_layers, batch, hidden_size), jnp.float32)

    logits, aux, (h_n, c_n) = lstm_text_generation_forward(params, x_ids, (h0, c0))
    jax.block_until_ready((logits, h_n, c_n))

    ref_logits, (ref_hn, ref_cn) = _reference_forward(params, x_ids, (h0, c0))
    # bf16 operands on the MXU -> compare against the f32 reference with a
    # bf16-appropriate tolerance.
    assert jnp.allclose(logits, ref_logits, atol=2e-2, rtol=2e-2), "logits mismatch"
    assert jnp.allclose(h_n, ref_hn, atol=2e-2, rtol=2e-2), "h_n mismatch"
    assert jnp.allclose(c_n, ref_cn, atol=2e-2, rtol=2e-2), "c_n mismatch"
    assert aux is None
    assert logits.shape == (batch, vocab_size)
    assert h_n.shape == (num_layers, batch, hidden_size)
    assert c_n.shape == (num_layers, batch, hidden_size)

    print("KERNEL_OK")
</pallas_src>

<mosaic_0001>
module attributes {stable_mosaic.version = 11 : i64} {
  func.func @_lstm_recurrence_kernel(%arg0: i32, %arg1: memref<8x2x128xf32, #tpu.memory_space<vmem>>, %arg2: memref<2x32xf32, #tpu.memory_space<vmem>>, %arg3: memref<2x32xf32, #tpu.memory_space<vmem>>, %arg4: memref<32x128xbf16, #tpu.memory_space<vmem>>, %arg5: memref<8x2x32xbf16, #tpu.memory_space<vmem>>, %arg6: memref<2x32xf32, #tpu.memory_space<vmem>>, %arg7: memref<2x32xf32, #tpu.memory_space<vmem>>, %arg8: memref<2x32xf32, #tpu.memory_space<vmem>>) attributes {dimension_semantics = [#tpu.dimension_semantics<arbitrary>], iteration_bounds = array<i64: 1>, scalar_prefetch = 0 : i64, scratch_operands = 2 : i64, tpu.core_type = #tpu.core_type<tc>, window_params = [{transform_indices = @transform_0, window_bounds = array<i64: 8, 2, 128>}, {pipeline_mode = #tpu.pipeline_mode<synchronous>, transform_indices = @transform_1, window_bounds = array<i64: 2, 32>}, {pipeline_mode = #tpu.pipeline_mode<synchronous>, transform_indices = @transform_2, window_bounds = array<i64: 2, 32>}, {pipeline_mode = #tpu.pipeline_mode<synchronous>, transform_indices = @transform_3, window_bounds = array<i64: 32, 128>}, {transform_indices = @transform_4, window_bounds = array<i64: 8, 2, 32>}, {pipeline_mode = #tpu.pipeline_mode<synchronous>, transform_indices = @transform_5, window_bounds = array<i64: 2, 32>}]} {
    %c0_i32 = arith.constant 0 : i32
    %0 = arith.cmpi eq, %arg0, %c0_i32 : i32
    %1 = arith.extui %0 : i1 to i32
    %c0_i32_0 = arith.constant 0 : i32
    %2 = arith.cmpi ne, %1, %c0_i32_0 : i32
    scf.if %2 {
      %c0_49 = arith.constant 0 : index
      %c0_50 = arith.constant 0 : index
      %263 = vector.load %arg2[%c0_49, %c0_50] : memref<2x32xf32, #tpu.memory_space<vmem>>, vector<2x32xf32>
      %c0_51 = arith.constant 0 : index
      %c0_52 = arith.constant 0 : index
      %264 = vector.load %arg7[%c0_51, %c0_52] : memref<2x32xf32, #tpu.memory_space<vmem>>, vector<2x32xf32>
      tpu.vector_store %arg7[%c0_51, %c0_52], %263 {strides = array<i32>} : memref<2x32xf32, #tpu.memory_space<vmem>>, vector<2x32xf32>,
      %c0_53 = arith.constant 0 : index
      %c0_54 = arith.constant 0 : index
      %265 = vector.load %arg3[%c0_53, %c0_54] : memref<2x32xf32, #tpu.memory_space<vmem>>, vector<2x32xf32>
      %c0_55 = arith.constant 0 : index
      %c0_56 = arith.constant 0 : index
      %266 = vector.load %arg8[%c0_55, %c0_56] : memref<2x32xf32, #tpu.memory_space<vmem>>, vector<2x32xf32>
      tpu.vector_store %arg8[%c0_55, %c0_56], %265 {strides = array<i32>} : memref<2x32xf32, #tpu.memory_space<vmem>>, vector<2x32xf32>,
    } else {
    }
    %c0 = arith.constant 0 : index
    %c0_1 = arith.constant 0 : index
    %3 = vector.load %arg7[%c0, %c0_1] : memref<2x32xf32, #tpu.memory_space<vmem>>, vector<2x32xf32>
    %c0_2 = arith.constant 0 : index
    %c0_3 = arith.constant 0 : index
    %4 = vector.load %arg8[%c0_2, %c0_3] : memref<2x32xf32, #tpu.memory_space<vmem>>, vector<2x32xf32>
    %c0_4 = arith.constant 0 : index
    %c0_5 = arith.constant 0 : index
    %c0_6 = arith.constant 0 : index
    %5 = vector.load %arg1[%c0_4, %c0_5, %c0_6] : memref<8x2x128xf32, #tpu.memory_space<vmem>>, vector<8x2x128xf32>
    %c0_7 = arith.constant 0 : index
    %c0_8 = arith.constant 0 : index
    %6 = vector.load %arg4[%c0_7, %c0_8] : memref<32x128xbf16, #tpu.memory_space<vmem>>, vector<32x128xbf16>
    %7 = vector.extract_strided_slice %5 {offsets = [0, 0, 0], sizes = [1, 2, 128], strides = [1, 1, 1]} : vector<8x2x128xf32> to vector<1x2x128xf32>
    %8 = vector.shape_cast %7 : vector<1x2x128xf32> to vector<2x128xf32>
    %9 = arith.truncf %3 : vector<2x32xf32> to vector<2x32xbf16>
    %cst = arith.constant dense<0.000000e+00> : vector<2x128xf32>
    %10 = tpu.matmul %9, %6, %cst {dimension_numbers = #tpu.dot_dimension_numbers<[1], [0], [0], [1], [0, 0, 1, 1], [], []>} : vector<2x32xbf16>, vector<32x128xbf16>, vector<2x128xf32> -> vector<2x128xf32>
    %11 = arith.addf %8, %10 : vector<2x128xf32>
    %12 = vector.extract_strided_slice %11 {offsets = [0, 0], sizes = [2, 32], strides = [1, 1]} : vector<2x128xf32> to vector<2x32xf32>
    %13 = arith.negf %12 : vector<2x32xf32>
    %14 = math.exp %13 : vector<2x32xf32>
    %cst_9 = arith.constant 1.000000e+00 : f32
    %15 = vector.broadcast %cst_9 : f32 to vector<2x32xf32>
    %16 = arith.addf %15, %14 : vector<2x32xf32>
    %17 = arith.divf %15, %16 : vector<2x32xf32>
    %18 = vector.extract_strided_slice %11 {offsets = [0, 32], sizes = [2, 32], strides = [1, 1]} : vector<2x128xf32> to vector<2x32xf32>
    %19 = arith.negf %18 : vector<2x32xf32>
    %20 = math.exp %19 : vector<2x32xf32>
    %cst_10 = arith.constant 1.000000e+00 : f32
    %21 = vector.broadcast %cst_10 : f32 to vector<2x32xf32>
    %22 = arith.addf %21, %20 : vector<2x32xf32>
    %23 = arith.divf %21, %22 : vector<2x32xf32>
    %24 = vector.extract_strided_slice %11 {offsets = [0, 64], sizes = [2, 32], strides = [1, 1]} : vector<2x128xf32> to vector<2x32xf32>
    %25 = math.tanh %24 : vector<2x32xf32>
    %26 = vector.extract_strided_slice %11 {offsets = [0, 96], sizes = [2, 32], strides = [1, 1]} : vector<2x128xf32> to vector<2x32xf32>
    %27 = arith.negf %26 : vector<2x32xf32>
    %28 = math.exp %27 : vector<2x32xf32>
    %cst_11 = arith.constant 1.000000e+00 : f32
    %29 = vector.broadcast %cst_11 : f32 to vector<2x32xf32>
    %30 = arith.addf %29, %28 : vector<2x32xf32>
    %31 = arith.divf %29, %30 : vector<2x32xf32>
    %32 = arith.mulf %23, %4 : vector<2x32xf32>
    %33 = arith.mulf %17, %25 : vector<2x32xf32>
    %34 = arith.addf %32, %33 : vector<2x32xf32>
    %35 = math.tanh %34 : vector<2x32xf32>
    %36 = arith.mulf %31, %35 : vector<2x32xf32>
    %37 = vector.extract_strided_slice %5 {offsets = [1, 0, 0], sizes = [1, 2, 128], strides = [1, 1, 1]} : vector<8x2x128xf32> to vector<1x2x128xf32>
    %38 = vector.shape_cast %37 : vector<1x2x128xf32> to vector<2x128xf32>
    %39 = arith.truncf %36 : vector<2x32xf32> to vector<2x32xbf16>
    %cst_12 = arith.constant dense<0.000000e+00> : vector<2x128xf32>
    %40 = tpu.matmul %39, %6, %cst_12 {dimension_numbers = #tpu.dot_dimension_numbers<[1], [0], [0], [1], [0, 0, 1, 1], [], []>} : vector<2x32xbf16>, vector<32x128xbf16>, vector<2x128xf32> -> vector<2x128xf32>
    %41 = arith.addf %38, %40 : vector<2x128xf32>
    %42 = vector.extract_strided_slice %41 {offsets = [0, 0], sizes = [2, 32], strides = [1, 1]} : vector<2x128xf32> to vector<2x32xf32>
    %43 = arith.negf %42 : vector<2x32xf32>
    %44 = math.exp %43 : vector<2x32xf32>
    %cst_13 = arith.constant 1.000000e+00 : f32
    %45 = vector.broadcast %cst_13 : f32 to vector<2x32xf32>
    %46 = arith.addf %45, %44 : vector<2x32xf32>
    %47 = arith.divf %45, %46 : vector<2x32xf32>
    %48 = vector.extract_strided_slice %41 {offsets = [0, 32], sizes = [2, 32], strides = [1, 1]} : vector<2x128xf32> to vector<2x32xf32>
    %49 = arith.negf %48 : vector<2x32xf32>
    %50 = math.exp %49 : vector<2x32xf32>
    %cst_14 = arith.constant 1.000000e+00 : f32
    %51 = vector.broadcast %cst_14 : f32 to vector<2x32xf32>
    %52 = arith.addf %51, %50 : vector<2x32xf32>
    %53 = arith.divf %51, %52 : vector<2x32xf32>
    %54 = vector.extract_strided_slice %41 {offsets = [0, 64], sizes = [2, 32], strides = [1, 1]} : vector<2x128xf32> to vector<2x32xf32>
    %55 = math.tanh %54 : vector<2x32xf32>
    %56 = vector.extract_strided_slice %41 {offsets = [0, 96], sizes = [2, 32], strides = [1, 1]} : vector<2x128xf32> to vector<2x32xf32>
    %57 = arith.negf %56 : vector<2x32xf32>
    %58 = math.exp %57 : vector<2x32xf32>
    %cst_15 = arith.constant 1.000000e+00 : f32
    %59 = vector.broadcast %cst_15 : f32 to vector<2x32xf32>
    %60 = arith.addf %59, %58 : vector<2x32xf32>
    %61 = arith.divf %59, %60 : vector<2x32xf32>
    %62 = arith.mulf %53, %34 : vector<2x32xf32>
    %63 = arith.mulf %47, %55 : vector<2x32xf32>
    %64 = arith.addf %62, %63 : vector<2x32xf32>
    %65 = math.tanh %64 : vector<2x32xf32>
    %66 = arith.mulf %61, %65 : vector<2x32xf32>
    %67 = vector.extract_strided_slice %5 {offsets = [2, 0, 0], sizes = [1, 2, 128], strides = [1, 1, 1]} : vector<8x2x128xf32> to vector<1x2x128xf32>
    %68 = vector.shape_cast %67 : vector<1x2x128xf32> to vector<2x128xf32>
    %69 = arith.truncf %66 : vector<2x32xf32> to vector<2x32xbf16>
    %cst_16 = arith.constant dense<0.000000e+00> : vector<2x128xf32>
    %70 = tpu.matmul %69, %6, %cst_16 {dimension_numbers = #tpu.dot_dimension_numbers<[1], [0], [0], [1], [0, 0, 1, 1], [], []>} : vector<2x32xbf16>, vector<32x128xbf16>, vector<2x128xf32> -> vector<2x128xf32>
    %71 = arith.addf %68, %70 : vector<2x128xf32>
    %72 = vector.extract_strided_slice %71 {offsets = [0, 0], sizes = [2, 32], strides = [1, 1]} : vector<2x128xf32> to vector<2x32xf32>
    %73 = arith.negf %72 : vector<2x32xf32>
    %74 = math.exp %73 : vector<2x32xf32>
    %cst_17 = arith.constant 1.000000e+00 : f32
    %75 = vector.broadcast %cst_17 : f32 to vector<2x32xf32>
    %76 = arith.addf %75, %74 : vector<2x32xf32>
    %77 = arith.divf %75, %76 : vector<2x32xf32>
    %78 = vector.extract_strided_slice %71 {offsets = [0, 32], sizes = [2, 32], strides = [1, 1]} : vector<2x128xf32> to vector<2x32xf32>
    %79 = arith.negf %78 : vector<2x32xf32>
    %80 = math.exp %79 : vector<2x32xf32>
    %cst_18 = arith.constant 1.000000e+00 : f32
    %81 = vector.broadcast %cst_18 : f32 to vector<2x32xf32>
    %82 = arith.addf %81, %80 : vector<2x32xf32>
    %83 = arith.divf %81, %82 : vector<2x32xf32>
    %84 = vector.extract_strided_slice %71 {offsets = [0, 64], sizes = [2, 32], strides = [1, 1]} : vector<2x128xf32> to vector<2x32xf32>
    %85 = math.tanh %84 : vector<2x32xf32>
    %86 = vector.extract_strided_slice %71 {offsets = [0, 96], sizes = [2, 32], strides = [1, 1]} : vector<2x128xf32> to vector<2x32xf32>
    %87 = arith.negf %86 : vector<2x32xf32>
    %88 = math.exp %87 : vector<2x32xf32>
    %cst_19 = arith.constant 1.000000e+00 : f32
    %89 = vector.broadcast %cst_19 : f32 to vector<2x32xf32>
    %90 = arith.addf %89, %88 : vector<2x32xf32>
    %91 = arith.divf %89, %90 : vector<2x32xf32>
    %92 = arith.mulf %83, %64 : vector<2x32xf32>
    %93 = arith.mulf %77, %85 : vector<2x32xf32>
    %94 = arith.addf %92, %93 : vector<2x32xf32>
    %95 = math.tanh %94 : vector<2x32xf32>
    %96 = arith.mulf %91, %95 : vector<2x32xf32>
    %97 = vector.extract_strided_slice %5 {offsets = [3, 0, 0], sizes = [1, 2, 128], strides = [1, 1, 1]} : vector<8x2x128xf32> to vector<1x2x128xf32>
    %98 = vector.shape_cast %97 : vector<1x2x128xf32> to vector<2x128xf32>
    %99 = arith.truncf %96 : vector<2x32xf32> to vector<2x32xbf16>
    %cst_20 = arith.constant dense<0.000000e+00> : vector<2x128xf32>
    %100 = tpu.matmul %99, %6, %cst_20 {dimension_numbers = #tpu.dot_dimension_numbers<[1], [0], [0], [1], [0, 0, 1, 1], [], []>} : vector<2x32xbf16>, vector<32x128xbf16>, vector<2x128xf32> -> vector<2x128xf32>
    %101 = arith.addf %98, %100 : vector<2x128xf32>
    %102 = vector.extract_strided_slice %101 {offsets = [0, 0], sizes = [2, 32], strides = [1, 1]} : vector<2x128xf32> to vector<2x32xf32>
    %103 = arith.negf %102 : vector<2x32xf32>
    %104 = math.exp %103 : vector<2x32xf32>
    %cst_21 = arith.constant 1.000000e+00 : f32
    %105 = vector.broadcast %cst_21 : f32 to vector<2x32xf32>
    %106 = arith.addf %105, %104 : vector<2x32xf32>
    %107 = arith.divf %105, %106 : vector<2x32xf32>
    %108 = vector.extract_strided_slice %101 {offsets = [0, 32], sizes = [2, 32], strides = [1, 1]} : vector<2x128xf32> to vector<2x32xf32>
    %109 = arith.negf %108 : vector<2x32xf32>
    %110 = math.exp %109 : vector<2x32xf32>
    %cst_22 = arith.constant 1.000000e+00 : f32
    %111 = vector.broadcast %cst_22 : f32 to vector<2x32xf32>
    %112 = arith.addf %111, %110 : vector<2x32xf32>
    %113 = arith.divf %111, %112 : vector<2x32xf32>
    %114 = vector.extract_strided_slice %101 {offsets = [0, 64], sizes = [2, 32], strides = [1, 1]} : vector<2x128xf32> to vector<2x32xf32>
    %115 = math.tanh %114 : vector<2x32xf32>
    %116 = vector.extract_strided_slice %101 {offsets = [0, 96], sizes = [2, 32], strides = [1, 1]} : vector<2x128xf32> to vector<2x32xf32>
    %117 = arith.negf %116 : vector<2x32xf32>
    %118 = math.exp %117 : vector<2x32xf32>
    %cst_23 = arith.constant 1.000000e+00 : f32
    %119 = vector.broadcast %cst_23 : f32 to vector<2x32xf32>
    %120 = arith.addf %119, %118 : vector<2x32xf32>
    %121 = arith.divf %119, %120 : vector<2x32xf32>
    %122 = arith.mulf %113, %94 : vector<2x32xf32>
    %123 = arith.mulf %107, %115 : vector<2x32xf32>
    %124 = arith.addf %122, %123 : vector<2x32xf32>
    %125 = math.tanh %124 : vector<2x32xf32>
    %126 = arith.mulf %121, %125 : vector<2x32xf32>
    %127 = vector.extract_strided_slice %5 {offsets = [4, 0, 0], sizes = [1, 2, 128], strides = [1, 1, 1]} : vector<8x2x128xf32> to vector<1x2x128xf32>
    %128 = vector.shape_cast %127 : vector<1x2x128xf32> to vector<2x128xf32>
    %129 = arith.truncf %126 : vector<2x32xf32> to vector<2x32xbf16>
    %cst_24 = arith.constant dense<0.000000e+00> : vector<2x128xf32>
    %130 = tpu.matmul %129, %6, %cst_24 {dimension_numbers = #tpu.dot_dimension_numbers<[1], [0], [0], [1], [0, 0, 1, 1], [], []>} : vector<2x32xbf16>, vector<32x128xbf16>, vector<2x128xf32> -> vector<2x128xf32>
    %131 = arith.addf %128, %130 : vector<2x128xf32>
    %132 = vector.extract_strided_slice %131 {offsets = [0, 0], sizes = [2, 32], strides = [1, 1]} : vector<2x128xf32> to vector<2x32xf32>
    %133 = arith.negf %132 : vector<2x32xf32>
    %134 = math.exp %133 : vector<2x32xf32>
    %cst_25 = arith.constant 1.000000e+00 : f32
    %135 = vector.broadcast %cst_25 : f32 to vector<2x32xf32>
    %136 = arith.addf %135, %134 : vector<2x32xf32>
    %137 = arith.divf %135, %136 : vector<2x32xf32>
    %138 = vector.extract_strided_slice %131 {offsets = [0, 32], sizes = [2, 32], strides = [1, 1]} : vector<2x128xf32> to vector<2x32xf32>
    %139 = arith.negf %138 : vector<2x32xf32>
    %140 = math.exp %139 : vector<2x32xf32>
    %cst_26 = arith.constant 1.000000e+00 : f32
    %141 = vector.broadcast %cst_26 : f32 to vector<2x32xf32>
    %142 = arith.addf %141, %140 : vector<2x32xf32>
    %143 = arith.divf %141, %142 : vector<2x32xf32>
    %144 = vector.extract_strided_slice %131 {offsets = [0, 64], sizes = [2, 32], strides = [1, 1]} : vector<2x128xf32> to vector<2x32xf32>
    %145 = math.tanh %144 : vector<2x32xf32>
    %146 = vector.extract_strided_slice %131 {offsets = [0, 96], sizes = [2, 32], strides = [1, 1]} : vector<2x128xf32> to vector<2x32xf32>
    %147 = arith.negf %146 : vector<2x32xf32>
    %148 = math.exp %147 : vector<2x32xf32>
    %cst_27 = arith.constant 1.000000e+00 : f32
    %149 = vector.broadcast %cst_27 : f32 to vector<2x32xf32>
    %150 = arith.addf %149, %148 : vector<2x32xf32>
    %151 = arith.divf %149, %150 : vector<2x32xf32>
    %152 = arith.mulf %143, %124 : vector<2x32xf32>
    %153 = arith.mulf %137, %145 : vector<2x32xf32>
    %154 = arith.addf %152, %153 : vector<2x32xf32>
    %155 = math.tanh %154 : vector<2x32xf32>
    %156 = arith.mulf %151, %155 : vector<2x32xf32>
    %157 = vector.extract_strided_slice %5 {offsets = [5, 0, 0], sizes = [1, 2, 128], strides = [1, 1, 1]} : vector<8x2x128xf32> to vector<1x2x128xf32>
    %158 = vector.shape_cast %157 : vector<1x2x128xf32> to vector<2x128xf32>
    %159 = arith.truncf %156 : vector<2x32xf32> to vector<2x32xbf16>
    %cst_28 = arith.constant dense<0.000000e+00> : vector<2x128xf32>
    %160 = tpu.matmul %159, %6, %cst_28 {dimension_numbers = #tpu.dot_dimension_numbers<[1], [0], [0], [1], [0, 0, 1, 1], [], []>} : vector<2x32xbf16>, vector<32x128xbf16>, vector<2x128xf32> -> vector<2x128xf32>
    %161 = arith.addf %158, %160 : vector<2x128xf32>
    %162 = vector.extract_strided_slice %161 {offsets = [0, 0], sizes = [2, 32], strides = [1, 1]} : vector<2x128xf32> to vector<2x32xf32>
    %163 = arith.negf %162 : vector<2x32xf32>
    %164 = math.exp %163 : vector<2x32xf32>
    %cst_29 = arith.constant 1.000000e+00 : f32
    %165 = vector.broadcast %cst_29 : f32 to vector<2x32xf32>
    %166 = arith.addf %165, %164 : vector<2x32xf32>
    %167 = arith.divf %165, %166 : vector<2x32xf32>
    %168 = vector.extract_strided_slice %161 {offsets = [0, 32], sizes = [2, 32], strides = [1, 1]} : vector<2x128xf32> to vector<2x32xf32>
    %169 = arith.negf %168 : vector<2x32xf32>
    %170 = math.exp %169 : vector<2x32xf32>
    %cst_30 = arith.constant 1.000000e+00 : f32
    %171 = vector.broadcast %cst_30 : f32 to vector<2x32xf32>
    %172 = arith.addf %171, %170 : vector<2x32xf32>
    %173 = arith.divf %171, %172 : vector<2x32xf32>
    %174 = vector.extract_strided_slice %161 {offsets = [0, 64], sizes = [2, 32], strides = [1, 1]} : vector<2x128xf32> to vector<2x32xf32>
    %175 = math.tanh %174 : vector<2x32xf32>
    %176 = vector.extract_strided_slice %161 {offsets = [0, 96], sizes = [2, 32], strides = [1, 1]} : vector<2x128xf32> to vector<2x32xf32>
    %177 = arith.negf %176 : vector<2x32xf32>
    %178 = math.exp %177 : vector<2x32xf32>
    %cst_31 = arith.constant 1.000000e+00 : f32
    %179 = vector.broadcast %cst_31 : f32 to vector<2x32xf32>
    %180 = arith.addf %179, %178 : vector<2x32xf32>
    %181 = arith.divf %179, %180 : vector<2x32xf32>
    %182 = arith.mulf %173, %154 : vector<2x32xf32>
    %183 = arith.mulf %167, %175 : vector<2x32xf32>
    %184 = arith.addf %182, %183 : vector<2x32xf32>
    %185 = math.tanh %184 : vector<2x32xf32>
    %186 = arith.mulf %181, %185 : vector<2x32xf32>
    %187 = vector.extract_strided_slice %5 {offsets = [6, 0, 0], sizes = [1, 2, 128], strides = [1, 1, 1]} : vector<8x2x128xf32> to vector<1x2x128xf32>
    %188 = vector.shape_cast %187 : vector<1x2x128xf32> to vector<2x128xf32>
    %189 = arith.truncf %186 : vector<2x32xf32> to vector<2x32xbf16>
    %cst_32 = arith.constant dense<0.000000e+00> : vector<2x128xf32>
    %190 = tpu.matmul %189, %6, %cst_32 {dimension_numbers = #tpu.dot_dimension_numbers<[1], [0], [0], [1], [0, 0, 1, 1], [], []>} : vector<2x32xbf16>, vector<32x128xbf16>, vector<2x128xf32> -> vector<2x128xf32>
    %191 = arith.addf %188, %190 : vector<2x128xf32>
    %192 = vector.extract_strided_slice %191 {offsets = [0, 0], sizes = [2, 32], strides = [1, 1]} : vector<2x128xf32> to vector<2x32xf32>
    %193 = arith.negf %192 : vector<2x32xf32>
    %194 = math.exp %193 : vector<2x32xf32>
    %cst_33 = arith.constant 1.000000e+00 : f32
    %195 = vector.broadcast %cst_33 : f32 to vector<2x32xf32>
    %196 = arith.addf %195, %194 : vector<2x32xf32>
    %197 = arith.divf %195, %196 : vector<2x32xf32>
    %198 = vector.extract_strided_slice %191 {offsets = [0, 32], sizes = [2, 32], strides = [1, 1]} : vector<2x128xf32> to vector<2x32xf32>
    %199 = arith.negf %198 : vector<2x32xf32>
    %200 = math.exp %199 : vector<2x32xf32>
    %cst_34 = arith.constant 1.000000e+00 : f32
    %201 = vector.broadcast %cst_34 : f32 to vector<2x32xf32>
    %202 = arith.addf %201, %200 : vector<2x32xf32>
    %203 = arith.divf %201, %202 : vector<2x32xf32>
    %204 = vector.extract_strided_slice %191 {offsets = [0, 64], sizes = [2, 32], strides = [1, 1]} : vector<2x128xf32> to vector<2x32xf32>
    %205 = math.tanh %204 : vector<2x32xf32>
    %206 = vector.extract_strided_slice %191 {offsets = [0, 96], sizes = [2, 32], strides = [1, 1]} : vector<2x128xf32> to vector<2x32xf32>
    %207 = arith.negf %206 : vector<2x32xf32>
    %208 = math.exp %207 : vector<2x32xf32>
    %cst_35 = arith.constant 1.000000e+00 : f32
    %209 = vector.broadcast %cst_35 : f32 to vector<2x32xf32>
    %210 = arith.addf %209, %208 : vector<2x32xf32>
    %211 = arith.divf %209, %210 : vector<2x32xf32>
    %212 = arith.mulf %203, %184 : vector<2x32xf32>
    %213 = arith.mulf %197, %205 : vector<2x32xf32>
    %214 = arith.addf %212, %213 : vector<2x32xf32>
    %215 = math.tanh %214 : vector<2x32xf32>
    %216 = arith.mulf %211, %215 : vector<2x32xf32>
    %217 = vector.extract_strided_slice %5 {offsets = [7, 0, 0], sizes = [1, 2, 128], strides = [1, 1, 1]} : vector<8x2x128xf32> to vector<1x2x128xf32>
    %218 = vector.shape_cast %217 : vector<1x2x128xf32> to vector<2x128xf32>
    %219 = arith.truncf %216 : vector<2x32xf32> to vector<2x32xbf16>
    %cst_36 = arith.constant dense<0.000000e+00> : vector<2x128xf32>
    %220 = tpu.matmul %219, %6, %cst_36 {dimension_numbers = #tpu.dot_dimension_numbers<[1], [0], [0], [1], [0, 0, 1, 1], [], []>} : vector<2x32xbf16>, vector<32x128xbf16>, vector<2x128xf32> -> vector<2x128xf32>
    %221 = arith.addf %218, %220 : vector<2x128xf32>
    %222 = vector.extract_strided_slice %221 {offsets = [0, 0], sizes = [2, 32], strides = [1, 1]} : vector<2x128xf32> to vector<2x32xf32>
    %223 = arith.negf %222 : vector<2x32xf32>
    %224 = math.exp %223 : vector<2x32xf32>
    %cst_37 = arith.constant 1.000000e+00 : f32
    %225 = vector.broadcast %cst_37 : f32 to vector<2x32xf32>
    %226 = arith.addf %225, %224 : vector<2x32xf32>
    %227 = arith.divf %225, %226 : vector<2x32xf32>
    %228 = vector.extract_strided_slice %221 {offsets = [0, 32], sizes = [2, 32], strides = [1, 1]} : vector<2x128xf32> to vector<2x32xf32>
    %229 = arith.negf %228 : vector<2x32xf32>
    %230 = math.exp %229 : vector<2x32xf32>
    %cst_38 = arith.constant 1.000000e+00 : f32
    %231 = vector.broadcast %cst_38 : f32 to vector<2x32xf32>
    %232 = arith.addf %231, %230 : vector<2x32xf32>
    %233 = arith.divf %231, %232 : vector<2x32xf32>
    %234 = vector.extract_strided_slice %221 {offsets = [0, 64], sizes = [2, 32], strides = [1, 1]} : vector<2x128xf32> to vector<2x32xf32>
    %235 = math.tanh %234 : vector<2x32xf32>
    %236 = vector.extract_strided_slice %221 {offsets = [0, 96], sizes = [2, 32], strides = [1, 1]} : vector<2x128xf32> to vector<2x32xf32>
    %237 = arith.negf %236 : vector<2x32xf32>
    %238 = math.exp %237 : vector<2x32xf32>
    %cst_39 = arith.constant 1.000000e+00 : f32
    %239 = vector.broadcast %cst_39 : f32 to vector<2x32xf32>
    %240 = arith.addf %239, %238 : vector<2x32xf32>
    %241 = arith.divf %239, %240 : vector<2x32xf32>
    %242 = arith.mulf %233, %214 : vector<2x32xf32>
    %243 = arith.mulf %227, %235 : vector<2x32xf32>
    %244 = arith.addf %242, %243 : vector<2x32xf32>
    %245 = math.tanh %244 : vector<2x32xf32>
    %246 = arith.mulf %241, %245 : vector<2x32xf32>
    %247 = vector.shape_cast %36 : vector<2x32xf32> to vector<1x2x32xf32>
    %248 = vector.shape_cast %66 : vector<2x32xf32> to vector<1x2x32xf32>
    %249 = vector.shape_cast %96 : vector<2x32xf32> to vector<1x2x32xf32>
    %250 = vector.shape_cast %126 : vector<2x32xf32> to vector<1x2x32xf32>
    %251 = vector.shape_cast %156 : vector<2x32xf32> to vector<1x2x32xf32>
    %252 = vector.shape_cast %186 : vector<2x32xf32> to vector<1x2x32xf32>
    %253 = vector.shape_cast %216 : vector<2x32xf32> to vector<1x2x32xf32>
    %254 = vector.shape_cast %246 : vector<2x32xf32> to vector<1x2x32xf32>
    %255 = tpu.concatenate %247, %248, %249, %250, %251, %252, %253, %254 in 0 : vector<1x2x32xf32>, vector<1x2x32xf32>, vector<1x2x32xf32>, vector<1x2x32xf32>, vector<1x2x32xf32>, vector<1x2x32xf32>, vector<1x2x32xf32>, vector<1x2x32xf32> -> vector<8x2x32xf32>
    %256 = arith.truncf %255 : vector<8x2x32xf32> to vector<8x2x32xbf16>
    %c0_40 = arith.constant 0 : index
    %c0_41 = arith.constant 0 : index
    %c0_42 = arith.constant 0 : index
    %257 = vector.load %arg5[%c0_40, %c0_41, %c0_42] : memref<8x2x32xbf16, #tpu.memory_space<vmem>>, vector<8x2x32xbf16>
    tpu.vector_store %arg5[%c0_40, %c0_41, %c0_42], %256 {strides = array<i32>} : memref<8x2x32xbf16, #tpu.memory_space<vmem>>, vector<8x2x32xbf16>,
    %c0_43 = arith.constant 0 : index
    %c0_44 = arith.constant 0 : index
    %258 = vector.load %arg7[%c0_43, %c0_44] : memref<2x32xf32, #tpu.memory_space<vmem>>, vector<2x32xf32>
    tpu.vector_store %arg7[%c0_43, %c0_44], %246 {strides = array<i32>} : memref<2x32xf32, #tpu.memory_space<vmem>>, vector<2x32xf32>,
    %c0_45 = arith.constant 0 : index
    %c0_46 = arith.constant 0 : index
    %259 = vector.load %arg8[%c0_45, %c0_46] : memref<2x32xf32, #tpu.memory_space<vmem>>, vector<2x32xf32>
    tpu.vector_store %arg8[%c0_45, %c0_46], %244 {strides = array<i32>} : memref<2x32xf32, #tpu.memory_space<vmem>>, vector<2x32xf32>,
    %c0_i32_47 = arith.constant 0 : i32
    %260 = arith.cmpi eq, %arg0, %c0_i32_47 : i32
    %261 = arith.extui %260 : i1 to i32
    %c0_i32_48 = arith.constant 0 : i32
    %262 = arith.cmpi ne, %261, %c0_i32_48 : i32
    scf.if %262 {
      %c0_49 = arith.constant 0 : index
      %c0_50 = arith.constant 0 : index
      %263 = vector.load %arg6[%c0_49, %c0_50] : memref<2x32xf32, #tpu.memory_space<vmem>>, vector<2x32xf32>
      tpu.vector_store %arg6[%c0_49, %c0_50], %244 {strides = array<i32>} : memref<2x32xf32, #tpu.memory_space<vmem>>, vector<2x32xf32>,
    } else {
    }
    return
  }
  func.func @transform_0(%arg0: i32) -> (i32, i32, i32) {
    %c0_i32 = arith.constant 0 : i32
    %c0_i32_0 = arith.constant 0 : i32
    %c0_i32_1 = arith.constant 0 : i32
    return %arg0, %c0_i32, %c0_i32_0 : i32, i32, i32
  }
  func.func @transform_1(%arg0: i32) -> (i32, i32) {
    %c0_i32 = arith.constant 0 : i32
    %c0_i32_0 = arith.constant 0 : i32
    %c0_i32_1 = arith.constant 0 : i32
    return %c0_i32, %c0_i32_0 : i32, i32
  }
  func.func @transform_2(%arg0: i32) -> (i32, i32) {
    %c0_i32 = arith.constant 0 : i32
    %c0_i32_0 = arith.constant 0 : i32
    %c0_i32_1 = arith.constant 0 : i32
    return %c0_i32, %c0_i32_0 : i32, i32
  }
  func.func @transform_3(%arg0: i32) -> (i32, i32) {
    %c0_i32 = arith.constant 0 : i32
    %c0_i32_0 = arith.constant 0 : i32
    %c0_i32_1 = arith.constant 0 : i32
    return %c0_i32, %c0_i32_0 : i32, i32
  }
  func.func @transform_4(%arg0: i32) -> (i32, i32, i32) {
    %c0_i32 = arith.constant 0 : i32
    %c0_i32_0 = arith.constant 0 : i32
    %c0_i32_1 = arith.constant 0 : i32
    return %arg0, %c0_i32, %c0_i32_0 : i32, i32, i32
  }
  func.func @transform_5(%arg0: i32) -> (i32, i32) {
    %c0_i32 = arith.constant 0 : i32
    %c0_i32_0 = arith.constant 0 : i32
    %c0_i32_1 = arith.constant 0 : i32
    return %c0_i32, %c0_i32_0 : i32, i32
  }
}

module attributes {stable_mosaic.version = 11 : i64} {
  func.func @_matmul_bias_kernel(%arg0: i32, %arg1: memref<16x16xbf16, #tpu.memory_space<vmem>>, %arg2: memref<16x128xbf16, #tpu.memory_space<vmem>>, %arg3: memref<1x128xf32, #tpu.memory_space<vmem>>, %arg4: memref<16x128xf32, #tpu.memory_space<vmem>>) attributes {dimension_semantics = [#tpu.dimension_semantics<parallel>], iteration_bounds = array<i64: 1>, scalar_prefetch = 0 : i64, scratch_operands = 0 : i64, tpu.core_type = #tpu.core_type<tc>, window_params = [{transform_indices = @transform_0, window_bounds = array<i64: 16, 16>}, {pipeline_mode = #tpu.pipeline_mode<synchronous>, transform_indices = @transform_1, window_bounds = array<i64: 16, 128>}, {pipeline_mode = #tpu.pipeline_mode<synchronous>, transform_indices = @transform_2, window_bounds = array<i64: 1, 128>}, {transform_indices = @transform_3, window_bounds = array<i64: 16, 128>}]} {
    %c0 = arith.constant 0 : index
    %c0_0 = arith.constant 0 : index
    %0 = vector.load %arg1[%c0, %c0_0] : memref<16x16xbf16, #tpu.memory_space<vmem>>, vector<16x16xbf16>
    %c0_1 = arith.constant 0 : index
    %c0_2 = arith.constant 0 : index
    %1 = vector.load %arg2[%c0_1, %c0_2] : memref<16x128xbf16, #tpu.memory_space<vmem>>, vector<16x128xbf16>
    %cst = arith.constant dense<0.000000e+00> : vector<16x128xf32>
    %2 = tpu.matmul %0, %1, %cst {dimension_numbers = #tpu.dot_dimension_numbers<[1], [0], [0], [1], [0, 0, 1, 1], [], []>} : vector<16x16xbf16>, vector<16x128xbf16>, vector<16x128xf32> -> vector<16x128xf32>
    %c0_3 = arith.constant 0 : index
    %c0_4 = arith.constant 0 : index
    %3 = vector.load %arg3[%c0_3, %c0_4] : memref<1x128xf32, #tpu.memory_space<vmem>>, vector<1x128xf32>
    %4 = vector.broadcast %3 : vector<1x128xf32> to vector<16x128xf32>
    %5 = arith.addf %2, %4 : vector<16x128xf32>
    %c0_5 = arith.constant 0 : index
    %c0_6 = arith.constant 0 : index
    %6 = vector.load %arg4[%c0_5, %c0_6] : memref<16x128xf32, #tpu.memory_space<vmem>>, vector<16x128xf32>
    tpu.vector_store %arg4[%c0_5, %c0_6], %5 {strides = array<i32>} : memref<16x128xf32, #tpu.memory_space<vmem>>, vector<16x128xf32>,
    return
  }
  func.func @transform_0(%arg0: i32) -> (i32, i32) {
    %c0_i32 = arith.constant 0 : i32
    %c0_i32_0 = arith.constant 0 : i32
    return %arg0, %c0_i32 : i32, i32
  }
  func.func @transform_1(%arg0: i32) -> (i32, i32) {
    %c0_i32 = arith.constant 0 : i32
    %c0_i32_0 = arith.constant 0 : i32
    %c0_i32_1 = arith.constant 0 : i32
    return %c0_i32, %c0_i32_0 : i32, i32
  }
  func.func @transform_2(%arg0: i32) -> (i32, i32) {
    %c0_i32 = arith.constant 0 : i32
    %c0_i32_0 = arith.constant 0 : i32
    %c0_i32_1 = arith.constant 0 : i32
    return %c0_i32, %c0_i32_0 : i32, i32
  }
  func.func @transform_3(%arg0: i32) -> (i32, i32) {
    %c0_i32 = arith.constant 0 : i32
    %c0_i32_0 = arith.constant 0 : i32
    return %arg0, %c0_i32 : i32, i32
  }
}

module attributes {stable_mosaic.version = 11 : i64} {
  func.func @_matmul_bias_kernel(%arg0: i32, %arg1: memref<16x32xbf16, #tpu.memory_space<vmem>>, %arg2: memref<32x128xbf16, #tpu.memory_space<vmem>>, %arg3: memref<1x128xf32, #tpu.memory_space<vmem>>, %arg4: memref<16x128xf32, #tpu.memory_space<vmem>>) attributes {dimension_semantics = [#tpu.dimension_semantics<parallel>], iteration_bounds = array<i64: 1>, scalar_prefetch = 0 : i64, scratch_operands = 0 : i64, tpu.core_type = #tpu.core_type<tc>, window_params = [{transform_indices = @transform_0, window_bounds = array<i64: 16, 32>}, {pipeline_mode = #tpu.pipeline_mode<synchronous>, transform_indices = @transform_1, window_bounds = array<i64: 32, 128>}, {pipeline_mode = #tpu.pipeline_mode<synchronous>, transform_indices = @transform_2, window_bounds = array<i64: 1, 128>}, {transform_indices = @transform_3, window_bounds = array<i64: 16, 128>}]} {
    %c0 = arith.constant 0 : index
    %c0_0 = arith.constant 0 : index
    %0 = vector.load %arg1[%c0, %c0_0] : memref<16x32xbf16, #tpu.memory_space<vmem>>, vector<16x32xbf16>
    %c0_1 = arith.constant 0 : index
    %c0_2 = arith.constant 0 : index
    %1 = vector.load %arg2[%c0_1, %c0_2] : memref<32x128xbf16, #tpu.memory_space<vmem>>, vector<32x128xbf16>
    %cst = arith.constant dense<0.000000e+00> : vector<16x128xf32>
    %2 = tpu.matmul %0, %1, %cst {dimension_numbers = #tpu.dot_dimension_numbers<[1], [0], [0], [1], [0, 0, 1, 1], [], []>} : vector<16x32xbf16>, vector<32x128xbf16>, vector<16x128xf32> -> vector<16x128xf32>
    %c0_3 = arith.constant 0 : index
    %c0_4 = arith.constant 0 : index
    %3 = vector.load %arg3[%c0_3, %c0_4] : memref<1x128xf32, #tpu.memory_space<vmem>>, vector<1x128xf32>
    %4 = vector.broadcast %3 : vector<1x128xf32> to vector<16x128xf32>
    %5 = arith.addf %2, %4 : vector<16x128xf32>
    %c0_5 = arith.constant 0 : index
    %c0_6 = arith.constant 0 : index
    %6 = vector.load %arg4[%c0_5, %c0_6] : memref<16x128xf32, #tpu.memory_space<vmem>>, vector<16x128xf32>
    tpu.vector_store %arg4[%c0_5, %c0_6], %5 {strides = array<i32>} : memref<16x128xf32, #tpu.memory_space<vmem>>, vector<16x128xf32>,
    return
  }
  func.func @transform_0(%arg0: i32) -> (i32, i32) {
    %c0_i32 = arith.constant 0 : i32
    %c0_i32_0 = arith.constant 0 : i32
    return %arg0, %c0_i32 : i32, i32
  }
  func.func @transform_1(%arg0: i32) -> (i32, i32) {
    %c0_i32 = arith.constant 0 : i32
    %c0_i32_0 = arith.constant 0 : i32
    %c0_i32_1 = arith.constant 0 : i32
    return %c0_i32, %c0_i32_0 : i32, i32
  }
  func.func @transform_2(%arg0: i32) -> (i32, i32) {
    %c0_i32 = arith.constant 0 : i32
    %c0_i32_0 = arith.constant 0 : i32
    %c0_i32_1 = arith.constant 0 : i32
    return %c0_i32, %c0_i32_0 : i32, i32
  }
  func.func @transform_3(%arg0: i32) -> (i32, i32) {
    %c0_i32 = arith.constant 0 : i32
    %c0_i32_0 = arith.constant 0 : i32
    return %arg0, %c0_i32 : i32, i32
  }
}

module attributes {stable_mosaic.version = 11 : i64} {
  func.func @_matmul_bias_kernel(%arg0: i32, %arg1: memref<2x32xbf16, #tpu.memory_space<vmem>>, %arg2: memref<32x64xbf16, #tpu.memory_space<vmem>>, %arg3: memref<1x64xf32, #tpu.memory_space<vmem>>, %arg4: memref<2x64xf32, #tpu.memory_space<vmem>>) attributes {dimension_semantics = [#tpu.dimension_semantics<parallel>], iteration_bounds = array<i64: 1>, scalar_prefetch = 0 : i64, scratch_operands = 0 : i64, tpu.core_type = #tpu.core_type<tc>, window_params = [{pipeline_mode = #tpu.pipeline_mode<synchronous>, transform_indices = @transform_0, window_bounds = array<i64: 2, 32>}, {transform_indices = @transform_1, window_bounds = array<i64: 32, 64>}, {transform_indices = @transform_2, window_bounds = array<i64: 1, 64>}, {transform_indices = @transform_3, window_bounds = array<i64: 2, 64>}]} {
    %c0 = arith.constant 0 : index
    %c0_0 = arith.constant 0 : index
    %0 = vector.load %arg1[%c0, %c0_0] : memref<2x32xbf16, #tpu.memory_space<vmem>>, vector<2x32xbf16>
    %c0_1 = arith.constant 0 : index
    %c0_2 = arith.constant 0 : index
    %1 = vector.load %arg2[%c0_1, %c0_2] : memref<32x64xbf16, #tpu.memory_space<vmem>>, vector<32x64xbf16>
    %cst = arith.constant dense<0.000000e+00> : vector<2x64xf32>
    %2 = tpu.matmul %0, %1, %cst {dimension_numbers = #tpu.dot_dimension_numbers<[1], [0], [0], [1], [0, 0, 1, 1], [], []>} : vector<2x32xbf16>, vector<32x64xbf16>, vector<2x64xf32> -> vector<2x64xf32>
    %c0_3 = arith.constant 0 : index
    %c0_4 = arith.constant 0 : index
    %3 = vector.load %arg3[%c0_3, %c0_4] : memref<1x64xf32, #tpu.memory_space<vmem>>, vector<1x64xf32>
    %4 = vector.broadcast %3 : vector<1x64xf32> to vector<2x64xf32>
    %5 = arith.addf %2, %4 : vector<2x64xf32>
    %c0_5 = arith.constant 0 : index
    %c0_6 = arith.constant 0 : index
    %6 = vector.load %arg4[%c0_5, %c0_6] : memref<2x64xf32, #tpu.memory_space<vmem>>, vector<2x64xf32>
    tpu.vector_store %arg4[%c0_5, %c0_6], %5 {strides = array<i32>} : memref<2x64xf32, #tpu.memory_space<vmem>>, vector<2x64xf32>,
    return
  }
  func.func @transform_0(%arg0: i32) -> (i32, i32) {
    %c0_i32 = arith.constant 0 : i32
    %c0_i32_0 = arith.constant 0 : i32
    %c0_i32_1 = arith.constant 0 : i32
    return %c0_i32, %c0_i32_0 : i32, i32
  }
  func.func @transform_1(%arg0: i32) -> (i32, i32) {
    %c0_i32 = arith.constant 0 : i32
    %c0_i32_0 = arith.constant 0 : i32
    return %c0_i32, %arg0 : i32, i32
  }
  func.func @transform_2(%arg0: i32) -> (i32, i32) {
    %c0_i32 = arith.constant 0 : i32
    %c0_i32_0 = arith.constant 0 : i32
    return %c0_i32, %arg0 : i32, i32
  }
  func.func @transform_3(%arg0: i32) -> (i32, i32) {
    %c0_i32 = arith.constant 0 : i32
    %c0_i32_0 = arith.constant 0 : i32
    return %c0_i32, %arg0 : i32, i32
  }
}

</mosaic_0001>

<bundles_post_ra>
// kernel: lstm_text_generation_forward.9
= control target key start
LH: loop header
LB: loop body
LE: loop exit
PB: predicated region body
PF: predicated region fallthrough
CT: control target
= control target key end

     0   :  { %s147_s0 = inlined_call_operand.vmem [shape: bf16[2,32], index: 0, kind: input, shape index: {}]   ;;  %s148_s1 = inlined_call_operand.vmem [shape: bf16[32,64], index: 1, kind: input, shape index: {}]   ;;  %s149_s2 = inlined_call_operand.vmem [shape: f32[1,64], index: 2, kind: input, shape index: {}]   ;;  %s150_s3 = inlined_call_operand.hbm [shape: f32[2,64], index: 3, kind: output, shape index: {}]  }
   0x1   :  { %v82_v0 = vld [vmem:[%s148_s1 + $0x8] sm:$0xff] }
   0x2   :  { %8 = vsyncpa [#allocation3], 0  ;;  %47 = vmatpush.bf16.msra.mxu0 %v82_v0  ;;  %v81_v1 = vld [vmem:[%s148_s1] sm:$0xff]  ;;  %vm37_vm0 = vcmask 261120   ;;  %s111_s20 = smov [#allocation2]   ;;  %s63_s24 = sshll.u32 %s150_s3, 4  ;;  %s64_s24 = int_to_ptr.hbm [resolvable:$true] %s63_s24 }
   0x3   :  { %v16_v2 = vld [vmem:[%s147_s0] sm:$0x1]  ;;  %s61_s21 = sshll.u32 %s111_s20, 4  ;;  %vm54_vm1 = vcmask 517120   ;;  %s62_s21 = int_to_ptr.vmem [resolvable:$true] %s61_s21 }
   0x4   :  { %v84_v3 = vld [vmem:[%s149_s2] ss:$0 sm:$0xff] }
   0x6   :  { %48 = vmatpush.bf16.msra.mxu0 %v81_v1 }
   0x9   :  { %80 = vmatmul.msk.bf16.vlgmr.msra.gmra.mxu0 %vm37_vm0, %v16_v2 }
  0x86   :  { %v50_v4 = vpop.f32.mrf.mxu0 }
  0x87   :  { %v51_v5 = vadd.f32 %v84_v3, %v50_v4 }
  0x89   :  { %55 = vst.msk [vmem:[#allocation2] sm:$0x3] %vm54_vm1, %v51_v5 }
  0x8a   :  { %66 = dma.vmem_to_hbm [thread:$0]  %s62_s21, 32, %s64_s24, [#allocation3]  }
  0x8e   :  { %v52_v6 = vpop.f32.mrf.mxu0 }
  0x8f   :  { %109 = dma.done.wait [#allocation3], 32  }
  0x90   :  { %110 = vsyncadd [#allocation3], 4294967264 }
  0x91   :  { %71 = vsyncpa [#allocation3], 1 }

// kernel: lstm_text_generation_forward.7
= control target key start
LH: loop header
LB: loop body
LE: loop exit
PB: predicated region body
PF: predicated region fallthrough
CT: control target
= control target key end

     0   :  { %vm42_vm0 = vcmask 261120   ;;  %s121_s1 = inlined_call_operand.vmem [shape: bf16[32,128], index: 1, kind: input, shape index: {}]   ;;  %s122_s2 = inlined_call_operand.vmem [shape: f32[1,128], index: 2, kind: input, shape index: {}]   ;;  %s123_s0 = inlined_call_operand.vmem [shape: bf16[16,32], index: 0, kind: input, shape index: {}]   ;;  %s124_s3 = inlined_call_operand.vmem [shape: f32[16,128], index: 3, kind: output, shape index: {}]  }
   0x1   :  { %v81_v0 = vld [vmem:[%s121_s1 + $0x8] sm:$0xff]  ;;  %v80_v1 = vld [vmem:[%s121_s1] sm:$0xff] }
   0x2   :  { %52 = vmatpush.bf16.msra.mxu0 %v81_v0  ;;  %v79_v2 = vld [vmem:[%s123_s0] sm:$0xff] }
   0x3   :  { %v82_v3 = vld [vmem:[%s122_s2] ss:$0 sm:$0xff] }
   0x6   :  { %53 = vmatpush.bf16.msra.mxu0 %v80_v1 }
   0x9   :  { %78 = vmatmul.msk.bf16.vlgmr.msra.gmra.mxu0 %vm42_vm0, %v79_v2 }
  0x86   :  { %v55_v4 = vpop.f32.mrf.mxu0 }
  0x87   :  { %v56_v5 = vadd.f32 %v82_v3, %v55_v4 }
  0x89   :  { %60 = vst [vmem:[%s124_s3] sm:$0xff] %v56_v5 }
  0x8e   :  { %v57_v6 = vpop.f32.mrf.mxu0 }
  0x8f   :  { %v58_v7 = vadd.f32 %v82_v3, %v57_v6 }
  0x91   :  { %61 = vst [vmem:[%s124_s3 + $0x8] sm:$0xff] %v58_v7 }

// kernel: lstm_text_generation_forward.5
= control target key start
LH: loop header
LB: loop body
LE: loop exit
PB: predicated region body
PF: predicated region fallthrough
CT: control target
= control target key end

     0   :  { %vm34_vm0 = vcmask 130048   ;;  %s105_s1 = inlined_call_operand.vmem [shape: bf16[16,128], index: 1, kind: input, shape index: {}]   ;;  %s106_s0 = inlined_call_operand.vmem [shape: bf16[16,16], index: 0, kind: input, shape index: {}]   ;;  %s107_s2 = inlined_call_operand.vmem [shape: f32[1,128], index: 2, kind: input, shape index: {}]   ;;  %s108_s3 = inlined_call_operand.vmem [shape: f32[16,128], index: 3, kind: output, shape index: {}]  }
   0x1   :  { %v68_v0 = vld [vmem:[%s105_s1] sm:$0xff] }
   0x2   :  { %v67_v1 = vld [vmem:[%s106_s0] sm:$0xff]  ;;  %45 = vmatpush.bf16.msra.mxu0 %v68_v0 }
   0x3   :  { %v69_v2 = vld [vmem:[%s107_s2] ss:$0 sm:$0xff] }
   0x5   :  { %66 = vmatmul.msk.bf16.vlgmr.msra.gmra.mxu0 %vm34_vm0, %v67_v1 }
  0x82   :  { %v47_v3 = vpop.f32.mrf.mxu0 }
  0x83   :  { %v48_v4 = vadd.f32 %v69_v2, %v47_v3 }
  0x85   :  { %52 = vst [vmem:[%s108_s3] sm:$0xff] %v48_v4 }
  0x8a   :  { %v49_v5 = vpop.f32.mrf.mxu0 }
  0x8b   :  { %v50_v6 = vadd.f32 %v69_v2, %v49_v5 }
  0x8d   :  { %53 = vst [vmem:[%s108_s3 + $0x8] sm:$0xff] %v50_v6 }

// kernel: lstm_text_generation_forward.6
= control target key start
LH: loop header
LB: loop body
LE: loop exit
PB: predicated region body
PF: predicated region fallthrough
CT: control target
= control target key end

     0   :  { %vm25_vm0 = vcmask 254976   ;;  %vm56_vm1 = vcmask 261120   ;;  %s713_s26 = smov 64   ;;  %s714_s27 = smov 32   ;;  %s913_s3 = inlined_call_operand.vmem [shape: bf16[32,128], index: 3, kind: input, shape index: {}]   ;;  %s914_s1 = inlined_call_operand.vmem [shape: f32[2,32], index: 1, kind: input, shape index: {}]   ;;  %s915_s2 = inlined_call_operand.vmem [shape: f32[2,32], index: 2, kind: input, shape index: {}]   ;;  %s916_s0 = inlined_call_operand.vmem [shape: f32[8,2,128], index: 0, kind: input, shape index: {}]   ;;  %s917_s4 = inlined_call_operand.vmem [shape: bf16[8,2,32], index: 4, kind: output, shape index: {0}]   ;;  %s918_s5 = inlined_call_operand.vmem [shape: f32[2,32], index: 5, kind: output, shape index: {1}]  }
   0x1   :  { %v645_v0 = vld [vmem:[%s913_s3 + $0x8] sm:$0xff]  ;;  %v24_v1 = vld [vmem:[%s914_s1] sm:$0x3]  ;;  %v32_v36 = vld [vmem:[%s916_s0 + $0x2] sm:$0x3]  ;;  %s715_s21 = smov 96  }
   0x2   :  { %26 = vst.msk [vmem:[#allocation2] sm:$0x3] %vm25_vm0, %v24_v1  ;;  %66 = vmatpush.bf16.msra.mxu0 %v645_v0  ;;  %v644_v2 = vld [vmem:[%s913_s3] sm:$0xff]  ;;  %128 = vmatpush.bf16.msra.mxu1 %v645_v0 }
   0x3   :  { %186 = vmatpush.bf16.msra.mxu2 %v645_v0  ;;  %244 = vmatpush.bf16.msra.mxu3 %v645_v0  ;;  %v27_v5 = vld [vmem:[%s915_s2] sm:$0x3] }
   0x4   :  { %28 = vst.msk [vmem:[#allocation3] sm:$0x3] %vm25_vm0, %v27_v5  ;;  %v31_v6 = vld [vmem:[%s916_s0] sm:$0x3] }
   0x6   :  { %67 = vmatpush.bf16.msra.mxu0 %v644_v2  ;;  %129 = vmatpush.bf16.msra.mxu1 %v644_v2 }
   0x7   :  { %187 = vmatpush.bf16.msra.mxu2 %v644_v2  ;;  %245 = vmatpush.bf16.msra.mxu3 %v644_v2 }
   0x9   :  { %v29_v3 = vld [vmem:[#allocation2] sm:$0x3] }
   0xa   :  { %302 = vmatpush.bf16.msrb.mxu0 %v645_v0  ;;  %360 = vmatpush.bf16.msrb.mxu1 %v645_v0  ;;  %v43_v4 = vpack.c.bf16 %v29_v3, %v29_v3 }
   0xb   :  { %418 = vmatpush.bf16.msrb.mxu2 %v645_v0  ;;  %476 = vmatpush.bf16.msrb.mxu3 %v645_v0  ;;  %v30_v11 = vld [vmem:[#allocation3] sm:$0x3]  ;;  %v33_v0 = vld [vmem:[%s916_s0 + $0x4] sm:$0x3] }
   0xc   :  { %628 = vmatmul.msk.bf16.vlgmr.msra.gmra.mxu0 %vm56_vm1, %v43_v4 }
   0xe   :  { %303 = vmatpush.bf16.msrb.mxu0 %v644_v2  ;;  %361 = vmatpush.bf16.msrb.mxu1 %v644_v2 }
   0xf   :  { %419 = vmatpush.bf16.msrb.mxu2 %v644_v2  ;;  %477 = vmatpush.bf16.msrb.mxu3 %v644_v2 }
  0x89   :  { %v69_v7 = vpop.f32.mrf.mxu0 }
  0x8a   :  { %v73_v8 = vadd.f32 %v69_v7, %v31_v6 }
  0x8c   :  { %649 = vtanh.f32 %v73_v8  ;;  %v629_v12 = vmul.f32 -1.442695, %v73_v8 }
  0x8e   :  { %651 = vpow2.f32 %v629_v12 }
  0x91   :  { %v71_v9 = vpop.f32.mrf.mxu0 }
  0x92   :  { %v650_v10 = vpop.eup %649 }
  0x93   :  { %100 = vrot.lane.b32.xlu0 %v650_v10, %s713_s26 }
  0x94   :  { %v652_v13 = vpop.eup %651 }
  0x95   :  { %v77_v14 = vadd.f32 1.0, %v652_v13 }
  0x97   :  { %653 = vrcp.f32 %v77_v14  ;;  %v89_v20 = vand.u32 2147483648, %v77_v14  ;;  %vm83_vm3 = vweird.f32 %v77_v14  ;;  %v87_v21 = vand.u32 2147483647, %v77_v14 }
  0x99   :  { %v90_v23 = vor.u32 1.1754944e-38, %v89_v20  ;;  %vm88_vm5 = vcmp.eq.f32.partialorder %v87_v21, 8.507059e+37 }
  0x9b   :  { %95 = vrot.lane.b32.xlu0 %v30_v11, %s714_s27 }
  0x9d   :  { %v654_v15 = vpop.eup %653 }
  0x9e   :  { %v79_v16 = vmul.f32 %v654_v15, %v77_v14  ;;  %vm84_vm2 = vweird.f32 %v654_v15 }
  0x9f   :  { %vm85_vm4 = vmor %vm83_vm3, %vm84_vm2 }
  0xa0   :  { %v80_v17 = vsub.f32 1.0, %v79_v16 }
  0xa2   :  { %v81_v18 = vmul.f32 %v654_v15, %v80_v17 }
  0xa4   :  { %v82_v19 = vadd.f32 %v654_v15, %v81_v18 }
  0xa6   :  { %v86_v22 = vsel %vm85_vm4, %v654_v15, %v82_v19 }
  0xa7   :  { %v91_v25 = vsel %vm88_vm5, %v90_v23, %v86_v22 }
 0x105   :  { %v101_v24 = vpop.permute.xlu0 %100 }
 0x106   :  { %v103_v26 = vmul.f32 %v101_v24, %v91_v25 }
 0x108   :  { %105 = vrot.lane.b32.xlu1 %v103_v26, %s714_s27 }
 0x10d   :  { %v96_v27 = vpop.permute.xlu0 %95 }
 0x10e   :  { %v98_v28 = vmul.f32 %v96_v27, %v91_v25 }
 0x17a   :  { %v106_v29 = vpop.permute.xlu1 %105 }
 0x17b   :  { %v108_v30 = vadd.f32 %v106_v29, %v98_v28  ;;  %v34_v28 = vld [vmem:[%s916_s0 + $0x6] sm:$0x3] }
 0x17d   :  { %655 = vtanh.f32 %v108_v30 }
 0x183   :  { %v656_v31 = vpop.eup %655 }
 0x184   :  { %111 = vrot.lane.b32.xlu1 %v656_v31, %s713_s26 }
 0x1f6   :  { %v112_v32 = vpop.permute.xlu1 %111 }
 0x1f7   :  { %v114_v33 = vmul.f32 %v112_v32, %v91_v25 }
 0x1f9   :  { %v768_v34 = vpack.c.bf16 %v114_v33, %v114_v33 }
 0x1fb   :  { %117 = vrot.lane.b32.xlu2 %v768_v34, %s714_s27 }
 0x255   :  { %v118_v35 = vpop.permute.xlu2 %117 }
 0x256   :  { %630 = vmatmul.msk.bf16.vlgmr.msra.gmra.mxu1 %vm56_vm1, %v118_v35 }
 0x2d3   :  { %v131_v37 = vpop.f32.mrf.mxu1 }
 0x2d4   :  { %v135_v38 = vadd.f32 %v131_v37, %v32_v36 }
 0x2d6   :  { %657 = vtanh.f32 %v135_v38  ;;  %v631_v41 = vmul.f32 -1.442695, %v135_v38 }
 0x2d8   :  { %659 = vpow2.f32 %v631_v41 }
 0x2db   :  { %v133_v39 = vpop.f32.mrf.mxu1 }
 0x2dc   :  { %v658_v40 = vpop.eup %657 }
 0x2dd   :  { %158 = vrot.lane.b32.xlu2 %v658_v40, %s713_s26 }
 0x2de   :  { %v660_v42 = vpop.eup %659 }
 0x2df   :  { %v139_v43 = vadd.f32 1.0, %v660_v42 }
 0x2e1   :  { %661 = vrcp.f32 %v139_v43  ;;  %v151_v49 = vand.u32 2147483648, %v139_v43  ;;  %vm145_vm7 = vweird.f32 %v139_v43  ;;  %v149_v50 = vand.u32 2147483647, %v139_v43 }
 0x2e3   :  { %v152_v52 = vor.u32 1.1754944e-38, %v151_v49  ;;  %vm150_vm9 = vcmp.eq.f32.partialorder %v149_v50, 8.507059e+37 }
 0x2e7   :  { %v662_v44 = vpop.eup %661 }
 0x2e8   :  { %v141_v45 = vmul.f32 %v662_v44, %v139_v43  ;;  %vm146_vm6 = vweird.f32 %v662_v44 }
 0x2e9   :  { %vm147_vm8 = vmor %vm145_vm7, %vm146_vm6 }
 0x2ea   :  { %v142_v46 = vsub.f32 1.0, %v141_v45 }
 0x2ec   :  { %v143_v47 = vmul.f32 %v662_v44, %v142_v46 }
 0x2ee   :  { %v144_v48 = vadd.f32 %v662_v44, %v143_v47 }
 0x2f0   :  { %v148_v51 = vsel %vm147_vm8, %v662_v44, %v144_v48 }
 0x2f1   :  { %v153_v54 = vsel %vm150_vm9, %v152_v52, %v148_v51 }
 0x2f2   :  { %v156_v56 = vmul.f32 %v153_v54, %v108_v30 }
 0x337   :  { %v159_v53 = vpop.permute.xlu2 %158 }
 0x338   :  { %v161_v55 = vmul.f32 %v159_v53, %v153_v54 }
 0x33a   :  { %163 = vrot.lane.b32.xlu0 %v161_v55, %s714_s27 }
 0x3ac   :  { %v164_v57 = vpop.permute.xlu0 %163 }
 0x3ad   :  { %v166_v58 = vadd.f32 %v164_v57, %v156_v56  ;;  %v35_v57 = vld [vmem:[%s916_s0 + $0x8] sm:$0x3] }
 0x3af   :  { %663 = vtanh.f32 %v166_v58 }
 0x3b5   :  { %v664_v59 = vpop.eup %663 }
 0x3b6   :  { %169 = vrot.lane.b32.xlu1 %v664_v59, %s713_s26 }
 0x428   :  { %v170_v60 = vpop.permute.xlu1 %169 }
 0x429   :  { %v172_v61 = vmul.f32 %v170_v60, %v153_v54 }
 0x42b   :  { %v779_v62 = vpack.c.bf16 %v172_v61, %v172_v61 }
 0x42d   :  { %175 = vrot.lane.b32.xlu2 %v779_v62, %s714_s27 }
 0x487   :  { %v176_v63 = vpop.permute.xlu2 %175 }
 0x488   :  { %632 = vmatmul.msk.bf16.vlgmr.msra.gmra.mxu2 %vm56_vm1, %v176_v63 }
 0x50b   :  { %v189_v1 = vpop.f32.mrf.mxu2 }
 0x50c   :  { %v193_v2 = vadd.f32 %v189_v1, %v33_v0 }
 0x50e   :  { %665 = vtanh.f32 %v193_v2  ;;  %v633_v5 = vmul.f32 -1.442695, %v193_v2 }
 0x510   :  { %667 = vpow2.f32 %v633_v5 }
 0x513   :  { %v191_v3 = vpop.f32.mrf.mxu2 }
 0x514   :  { %v666_v4 = vpop.eup %665 }
 0x515   :  { %216 = vrot.lane.b32.xlu0 %v666_v4, %s713_s26 }
 0x516   :  { %v668_v6 = vpop.eup %667 }
 0x517   :  { %v197_v7 = vadd.f32 1.0, %v668_v6 }
 0x519   :  { %669 = vrcp.f32 %v197_v7  ;;  %v209_v13 = vand.u32 2147483648, %v197_v7  ;;  %vm203_vm11 = vweird.f32 %v197_v7  ;;  %v207_v14 = vand.u32 2147483647, %v197_v7 }
 0x51b   :  { %v210_v16 = vor.u32 1.1754944e-38, %v209_v13  ;;  %vm208_vm13 = vcmp.eq.f32.partialorder %v207_v14, 8.507059e+37 }
 0x51f   :  { %v670_v8 = vpop.eup %669 }
 0x520   :  { %v199_v9 = vmul.f32 %v670_v8, %v197_v7  ;;  %vm204_vm10 = vweird.f32 %v670_v8 }
 0x521   :  { %vm205_vm12 = vmor %vm203_vm11, %vm204_vm10 }
 0x522   :  { %v200_v10 = vsub.f32 1.0, %v199_v9 }
 0x524   :  { %v201_v11 = vmul.f32 %v670_v8, %v200_v10 }
 0x526   :  { %v202_v12 = vadd.f32 %v670_v8, %v201_v11 }
 0x528   :  { %v206_v15 = vsel %vm205_vm12, %v670_v8, %v202_v12 }
 0x529   :  { %v211_v18 = vsel %vm208_vm13, %v210_v16, %v206_v15 }
 0x52a   :  { %v214_v20 = vmul.f32 %v211_v18, %v166_v58 }
 0x587   :  { %v217_v17 = vpop.permute.xlu0 %216 }
 0x588   :  { %v219_v19 = vmul.f32 %v217_v17, %v211_v18 }
 0x58a   :  { %221 = vrot.lane.b32.xlu1 %v219_v19, %s714_s27 }
 0x5fc   :  { %v222_v21 = vpop.permute.xlu1 %221 }
 0x5fd   :  { %v224_v22 = vadd.f32 %v222_v21, %v214_v20 }
 0x5ff   :  { %671 = vtanh.f32 %v224_v22 }
 0x605   :  { %v672_v23 = vpop.eup %671 }
 0x606   :  { %227 = vrot.lane.b32.xlu2 %v672_v23, %s713_s26 }
 0x660   :  { %v228_v24 = vpop.permute.xlu2 %227 }
 0x661   :  { %v230_v25 = vmul.f32 %v228_v24, %v211_v18 }
 0x663   :  { %v790_v26 = vpack.c.bf16 %v230_v25, %v230_v25 }
 0x665   :  { %233 = vrot.lane.b32.xlu0 %v790_v26, %s714_s27 }
 0x6d7   :  { %v234_v27 = vpop.permute.xlu0 %233 }
 0x6d8   :  { %634 = vmatmul.msk.bf16.vlgmr.msra.gmra.mxu3 %vm56_vm1, %v234_v27 }
 0x75b   :  { %v247_v29 = vpop.f32.mrf.mxu3 }
 0x75c   :  { %v251_v30 = vadd.f32 %v247_v29, %v34_v28 }
 0x75e   :  { %673 = vtanh.f32 %v251_v30  ;;  %v635_v33 = vmul.f32 -1.442695, %v251_v30 }
 0x760   :  { %675 = vpow2.f32 %v635_v33 }
 0x763   :  { %v249_v31 = vpop.f32.mrf.mxu3 }
 0x764   :  { %v674_v32 = vpop.eup %673 }
 0x765   :  { %274 = vrot.lane.b32.xlu1 %v674_v32, %s713_s26 }
 0x766   :  { %v676_v35 = vpop.eup %675 }
 0x767   :  { %v255_v36 = vadd.f32 1.0, %v676_v35 }
 0x769   :  { %677 = vrcp.f32 %v255_v36  ;;  %v267_v42 = vand.u32 2147483648, %v255_v36  ;;  %vm261_vm15 = vweird.f32 %v255_v36  ;;  %v265_v43 = vand.u32 2147483647, %v255_v36 }
 0x76b   :  { %v268_v45 = vor.u32 1.1754944e-38, %v267_v42  ;;  %vm266_vm3 = vcmp.eq.f32.partialorder %v265_v43, 8.507059e+37 }
 0x76f   :  { %v678_v37 = vpop.eup %677 }
 0x770   :  { %v257_v38 = vmul.f32 %v678_v37, %v255_v36  ;;  %vm262_vm14 = vweird.f32 %v678_v37 }
 0x771   :  { %vm263_vm2 = vmor %vm261_vm15, %vm262_vm14 }
 0x772   :  { %v258_v39 = vsub.f32 1.0, %v257_v38 }
 0x774   :  { %v259_v40 = vmul.f32 %v678_v37, %v258_v39 }
 0x776   :  { %v260_v41 = vadd.f32 %v678_v37, %v259_v40 }
 0x778   :  { %v264_v44 = vsel %vm263_vm2, %v678_v37, %v260_v41  ;;  %vm531_vm2 = vcmask 1040384  }
 0x779   :  { %v269_v47 = vsel %vm266_vm3, %v268_v45, %v264_v44 }
 0x77a   :  { %v272_v49 = vmul.f32 %v269_v47, %v224_v22  ;;  %v36_v22 = vld [vmem:[%s916_s0 + $0xa] sm:$0x3] }
 0x7d7   :  { %v275_v46 = vpop.permute.xlu1 %274 }
 0x7d8   :  { %v277_v48 = vmul.f32 %v275_v46, %v269_v47 }
 0x7da   :  { %279 = vrot.lane.b32.xlu2 %v277_v48, %s714_s27 }
 0x834   :  { %v280_v50 = vpop.permute.xlu2 %279 }
 0x835   :  { %v282_v51 = vadd.f32 %v280_v50, %v272_v49 }
 0x837   :  { %679 = vtanh.f32 %v282_v51 }
 0x83d   :  { %v680_v52 = vpop.eup %679 }
 0x83e   :  { %285 = vrot.lane.b32.xlu0 %v680_v52, %s713_s26  ;;  %v37_v52 = vld [vmem:[%s916_s0 + $0xc] sm:$0x3] }
 0x8b0   :  { %v286_v53 = vpop.permute.xlu0 %285 }
 0x8b1   :  { %v288_v54 = vmul.f32 %v286_v53, %v269_v47 }
 0x8b3   :  { %v801_v55 = vpack.c.bf16 %v288_v54, %v288_v54 }
 0x8b5   :  { %291 = vrot.lane.b32.xlu1 %v801_v55, %s714_s27 }
 0x927   :  { %v292_v56 = vpop.permute.xlu1 %291 }
 0x928   :  { %636 = vmatmul.msk.bf16.vlgmr.msrb.gmra.mxu0 %vm56_vm1, %v292_v56 }
 0x9a5   :  { %v305_v58 = vpop.f32.mrf.mxu0 }
 0x9a6   :  { %v309_v59 = vadd.f32 %v305_v58, %v35_v57 }
 0x9a8   :  { %681 = vtanh.f32 %v309_v59  ;;  %v637_v63 = vmul.f32 -1.442695, %v309_v59 }
 0x9aa   :  { %683 = vpow2.f32 %v637_v63 }
 0x9ad   :  { %v307_v60 = vpop.f32.mrf.mxu0 }
 0x9ae   :  { %v682_v61 = vpop.eup %681 }
 0x9af   :  { %332 = vrot.lane.b32.xlu2 %v682_v61, %s713_s26 }
 0x9b0   :  { %v684_v0 = vpop.eup %683 }
 0x9b1   :  { %v313_v1 = vadd.f32 1.0, %v684_v0 }
 0x9b3   :  { %685 = vrcp.f32 %v313_v1  ;;  %v325_v7 = vand.u32 2147483648, %v313_v1  ;;  %vm319_vm5 = vweird.f32 %v313_v1  ;;  %v323_v8 = vand.u32 2147483647, %v313_v1 }
 0x9b5   :  { %v326_v10 = vor.u32 1.1754944e-38, %v325_v7  ;;  %vm324_vm7 = vcmp.eq.f32.partialorder %v323_v8, 8.507059e+37 }
 0x9b9   :  { %v686_v2 = vpop.eup %685 }
 0x9ba   :  { %v315_v3 = vmul.f32 %v686_v2, %v313_v1  ;;  %vm320_vm4 = vweird.f32 %v686_v2 }
 0x9bb   :  { %vm321_vm6 = vmor %vm319_vm5, %vm320_vm4 }
 0x9bc   :  { %v316_v4 = vsub.f32 1.0, %v315_v3 }
 0x9be   :  { %v317_v5 = vmul.f32 %v686_v2, %v316_v4 }
 0x9c0   :  { %v318_v6 = vadd.f32 %v686_v2, %v317_v5 }
 0x9c2   :  { %v322_v9 = vsel %vm321_vm6, %v686_v2, %v318_v6  ;;  %vm588_vm6 = vcmask 253952  }
 0x9c3   :  { %v327_v12 = vsel %vm324_vm7, %v326_v10, %v322_v9 }
 0x9c4   :  { %v330_v14 = vmul.f32 %v327_v12, %v282_v51 }
 0xa09   :  { %v333_v11 = vpop.permute.xlu2 %332 }
 0xa0a   :  { %v335_v13 = vmul.f32 %v333_v11, %v327_v12 }
 0xa0c   :  { %337 = vrot.lane.b32.xlu0 %v335_v13, %s714_s27 }
 0xa7e   :  { %v338_v15 = vpop.permute.xlu0 %337 }
 0xa7f   :  { %v340_v16 = vadd.f32 %v338_v15, %v330_v14 }
 0xa81   :  { %687 = vtanh.f32 %v340_v16 }
 0xa87   :  { %v688_v17 = vpop.eup %687 }
 0xa88   :  { %343 = vrot.lane.b32.xlu1 %v688_v17, %s713_s26 }
 0xafa   :  { %v344_v18 = vpop.permute.xlu1 %343 }
 0xafb   :  { %v346_v19 = vmul.f32 %v344_v18, %v327_v12  ;;  %v38_v18 = vld [vmem:[%s916_s0 + $0xe] sm:$0x3] }
 0xafd   :  { %v812_v20 = vpack.c.bf16 %v346_v19, %v346_v19 }
 0xaff   :  { %349 = vrot.lane.b32.xlu2 %v812_v20, %s714_s27 }
 0xb59   :  { %v350_v21 = vpop.permute.xlu2 %349 }
 0xb5a   :  { %638 = vmatmul.msk.bf16.vlgmr.msrb.gmra.mxu1 %vm56_vm1, %v350_v21 }
 0xbd7   :  { %v363_v23 = vpop.f32.mrf.mxu1 }
 0xbd8   :  { %v367_v24 = vadd.f32 %v363_v23, %v36_v22 }
 0xbda   :  { %689 = vtanh.f32 %v367_v24  ;;  %v639_v28 = vmul.f32 -1.442695, %v367_v24  ;;  %v523_v24 = vrot.slane %v768_v34, 3 }
 0xbdc   :  { %691 = vpow2.f32 %v639_v28 }
 0xbdf   :  { %v365_v25 = vpop.f32.mrf.mxu1 }
 0xbe0   :  { %v690_v27 = vpop.eup %689  ;;  %v534_v25 = vsel %vm531_vm2, %v768_v34, %v523_v24 }
 0xbe1   :  { %390 = vrot.lane.b32.xlu0 %v690_v27, %s713_s26  ;;  %v526_v27 = vrot.slane %v801_v55, 3 }
 0xbe2   :  { %v692_v29 = vpop.eup %691 }
 0xbe3   :  { %v371_v30 = vadd.f32 1.0, %v692_v29  ;;  %v546_v28 = vsel %vm531_vm2, %v801_v55, %v526_v27 }
 0xbe5   :  { %693 = vrcp.f32 %v371_v30  ;;  %v383_v37 = vand.u32 2147483648, %v371_v30  ;;  %vm377_vm9 = vweird.f32 %v371_v30  ;;  %v381_v38 = vand.u32 2147483647, %v371_v30 }
 0xbe7   :  { %v384_v40 = vor.u32 1.1754944e-38, %v383_v37  ;;  %vm382_vm11 = vcmp.eq.f32.partialorder %v381_v38, 8.507059e+37 }
 0xbeb   :  { %v694_v31 = vpop.eup %693 }
 0xbec   :  { %v373_v32 = vmul.f32 %v694_v31, %v371_v30  ;;  %vm378_vm8 = vweird.f32 %v694_v31 }
 0xbed   :  { %vm379_vm10 = vmor %vm377_vm9, %vm378_vm8 }
 0xbee   :  { %v374_v33 = vsub.f32 1.0, %v373_v32 }
 0xbf0   :  { %v375_v35 = vmul.f32 %v694_v31, %v374_v33 }
 0xbf2   :  { %v376_v36 = vadd.f32 %v694_v31, %v375_v35 }
 0xbf4   :  { %v380_v39 = vsel %vm379_vm10, %v694_v31, %v376_v36 }
 0xbf5   :  { %v385_v42 = vsel %vm382_vm11, %v384_v40, %v380_v39 }
 0xbf6   :  { %v388_v44 = vmul.f32 %v385_v42, %v340_v16 }
 0xc53   :  { %v391_v41 = vpop.permute.xlu0 %390 }
 0xc54   :  { %v393_v43 = vmul.f32 %v391_v41, %v385_v42 }
 0xc56   :  { %395 = vrot.lane.b32.xlu1 %v393_v43, %s714_s27 }
 0xcc8   :  { %v396_v45 = vpop.permute.xlu1 %395 }
 0xcc9   :  { %v398_v46 = vadd.f32 %v396_v45, %v388_v44  ;;  %v524_v45 = vrot.slane %v779_v62, 3 }
 0xccb   :  { %695 = vtanh.f32 %v398_v46 }
 0xcd1   :  { %v696_v47 = vpop.eup %695 }
 0xcd2   :  { %401 = vrot.lane.b32.xlu2 %v696_v47, %s713_s26  ;;  %v538_v47 = vsel %vm531_vm2, %v779_v62, %v524_v45 }
 0xd2c   :  { %v402_v48 = vpop.permute.xlu2 %401 }
 0xd2d   :  { %v404_v49 = vmul.f32 %v402_v48, %v385_v42  ;;  %v527_v48 = vrot.slane %v812_v20, 3 }
 0xd2f   :  { %v823_v50 = vpack.c.bf16 %v404_v49, %v404_v49 }
 0xd31   :  { %407 = vrot.lane.b32.xlu0 %v823_v50, %s714_s27 }
 0xda3   :  { %v408_v51 = vpop.permute.xlu0 %407 }
 0xda4   :  { %640 = vmatmul.msk.bf16.vlgmr.msrb.gmra.mxu2 %vm56_vm1, %v408_v51  ;;  %v550_v51 = vsel %vm531_vm2, %v812_v20, %v527_v48  ;;  %v525_v20 = vrot.slane %v790_v26, 3 }
 0xe27   :  { %v421_v53 = vpop.f32.mrf.mxu2 }
 0xe28   :  { %v425_v54 = vadd.f32 %v421_v53, %v37_v52 }
 0xe2a   :  { %697 = vtanh.f32 %v425_v54  ;;  %v641_v58 = vmul.f32 -1.442695, %v425_v54 }
 0xe2c   :  { %699 = vpow2.f32 %v641_v58 }
 0xe2f   :  { %v423_v56 = vpop.f32.mrf.mxu2 }
 0xe30   :  { %v698_v57 = vpop.eup %697 }
 0xe31   :  { %448 = vrot.lane.b32.xlu1 %v698_v57, %s713_s26 }
 0xe32   :  { %v700_v59 = vpop.eup %699 }
 0xe33   :  { %v429_v60 = vadd.f32 1.0, %v700_v59  ;;  %v542_v59 = vsel %vm531_vm2, %v790_v26, %v525_v20 }
 0xe35   :  { %701 = vrcp.f32 %v429_v60  ;;  %v441_v3 = vand.u32 2147483648, %v429_v60  ;;  %vm435_vm13 = vweird.f32 %v429_v60  ;;  %v439_v4 = vand.u32 2147483647, %v429_v60 }
 0xe37   :  { %v442_v6 = vor.u32 1.1754944e-38, %v441_v3  ;;  %vm440_vm15 = vcmp.eq.f32.partialorder %v439_v4, 8.507059e+37 }
 0xe3b   :  { %v702_v61 = vpop.eup %701 }
 0xe3c   :  { %v431_v63 = vmul.f32 %v702_v61, %v429_v60  ;;  %vm436_vm12 = vweird.f32 %v702_v61  ;;  %v528_v60 = vrot.slane %v823_v50, 3 }
 0xe3d   :  { %vm437_vm14 = vmor %vm435_vm13, %vm436_vm12 }
 0xe3e   :  { %v432_v0 = vsub.f32 1.0, %v431_v63 }
 0xe40   :  { %v433_v1 = vmul.f32 %v702_v61, %v432_v0 }
 0xe42   :  { %v434_v2 = vadd.f32 %v702_v61, %v433_v1 }
 0xe44   :  { %v438_v5 = vsel %vm437_vm14, %v702_v61, %v434_v2  ;;  %v554_v61 = vsel %vm531_vm2, %v823_v50, %v528_v60 }
 0xe45   :  { %v443_v8 = vsel %vm440_vm15, %v442_v6, %v438_v5 }
 0xe46   :  { %v446_v10 = vmul.f32 %v443_v8, %v398_v46 }
 0xea3   :  { %v449_v7 = vpop.permute.xlu1 %448 }
 0xea4   :  { %v451_v9 = vmul.f32 %v449_v7, %v443_v8 }
 0xea6   :  { %453 = vrot.lane.b32.xlu2 %v451_v9, %s714_s27 }
 0xf00   :  { %v454_v11 = vpop.permute.xlu2 %453 }
 0xf01   :  { %v833_v12 = vadd.f32 %v454_v11, %v446_v10 }
 0xf03   :  { %703 = vtanh.f32 %v833_v12 }
 0xf09   :  { %v704_v13 = vpop.eup %703 }
 0xf0a   :  { %459 = vrot.lane.b32.xlu0 %v704_v13, %s713_s26 }
 0xf7c   :  { %v460_v14 = vpop.permute.xlu0 %459 }
 0xf7d   :  { %v462_v15 = vmul.f32 %v460_v14, %v443_v8 }
 0xf7f   :  { %v463_v16 = vpack.c.bf16 %v462_v15, %v462_v15 }
 0xf81   :  { %465 = vrot.lane.b32.xlu1 %v463_v16, %s714_s27  ;;  %v529_v29 = vrot.slane %v463_v16, 3 }
 0xf83   :  { %v558_v30 = vsel %vm531_vm2, %v463_v16, %v529_v29 }
 0xff3   :  { %v466_v17 = vpop.permute.xlu1 %465 }
 0xff4   :  { %642 = vmatmul.msk.bf16.vlgmr.msrb.gmra.mxu3 %vm56_vm1, %v466_v17 }
0x1077   :  { %v479_v19 = vpop.f32.mrf.mxu3 }
0x1078   :  { %v483_v21 = vadd.f32 %v479_v19, %v38_v18 }
0x107a   :  { %705 = vtanh.f32 %v483_v21  ;;  %v643_v31 = vmul.f32 -1.442695, %v483_v21 }
0x107c   :  { %707 = vpow2.f32 %v643_v31 }
0x107f   :  { %v481_v22 = vpop.f32.mrf.mxu3 }
0x1080   :  { %v706_v23 = vpop.eup %705 }
0x1081   :  { %506 = vrot.lane.b32.xlu2 %v706_v23, %s713_s26 }
0x1082   :  { %v708_v32 = vpop.eup %707 }
0x1083   :  { %v487_v33 = vadd.f32 1.0, %v708_v32 }
0x1085   :  { %709 = vrcp.f32 %v487_v33  ;;  %v499_v39 = vand.u32 2147483648, %v487_v33  ;;  %vm493_vm3 = vweird.f32 %v487_v33  ;;  %v497_v55 = vand.u32 2147483647, %v487_v33 }
0x1087   :  { %v500_v41 = vor.u32 1.1754944e-38, %v499_v39  ;;  %vm498_vm5 = vcmp.eq.f32.partialorder %v497_v55, 8.507059e+37 }
0x1089   :  { %564 = vrot.lane.b32.xlu2 %v534_v25, %s714_s27 }
0x108b   :  { %v710_v34 = vpop.eup %709 }
0x108c   :  { %v489_v35 = vmul.f32 %v710_v34, %v487_v33  ;;  %vm494_vm1 = vweird.f32 %v710_v34 }
0x108d   :  { %vm495_vm4 = vmor %vm493_vm3, %vm494_vm1 }
0x108e   :  { %v490_v36 = vsub.f32 1.0, %v489_v35 }
0x1090   :  { %v491_v37 = vmul.f32 %v710_v34, %v490_v36 }
0x1091   :  { %570 = vrot.lane.b32.xlu2 %v546_v28, %s714_s27 }
0x1092   :  { %v492_v38 = vadd.f32 %v710_v34, %v491_v37 }
0x1094   :  { %v496_v40 = vsel %vm495_vm4, %v710_v34, %v492_v38 }
0x1095   :  { %v501_v43 = vsel %vm498_vm5, %v500_v41, %v496_v40 }
0x1096   :  { %v504_v62 = vmul.f32 %v501_v43, %v833_v12 }
0x1099   :  { %576 = vrot.lane.b32.xlu2 %v558_v30, %s714_s27 }
0x10db   :  { %v507_v42 = vpop.permute.xlu2 %506 }
0x10dc   :  { %v509_v44 = vmul.f32 %v507_v42, %v501_v43 }
0x10de   :  { %511 = vrot.lane.b32.xlu0 %v509_v44, %s714_s27 }
0x10e3   :  { %v565_v46 = vpop.permute.xlu2 %564 }
0x10e4   :  { %589 = vst.msk [vmem:[%s917_s4] sm:$0x1] %vm588_vm6, %v565_v46 }
0x10e6   :  { %566 = vrot.lane.b32.xlu0 %v538_v47, %s714_s27 }
0x10eb   :  { %v571_v49 = vpop.permute.xlu2 %570 }
0x10ec   :  { %592 = vst.msk [vmem:[%s917_s4 + $0x3] sm:$0x1] %vm588_vm6, %v571_v49 }
0x10ee   :  { %572 = vrot.lane.b32.xlu0 %v550_v51, %s714_s27 }
0x10f3   :  { %v577_v52 = vpop.permute.xlu2 %576 }
0x10f4   :  { %595 = vst.msk [vmem:[%s917_s4 + $0x6] sm:$0x1] %vm588_vm6, %v577_v52 }
0x1150   :  { %v512_v53 = vpop.permute.xlu0 %511 }
0x1151   :  { %v514_v54 = vadd.f32 %v512_v53, %v504_v62 }
0x1153   :  { %711 = vtanh.f32 %v514_v54  ;;  %604 = vrot.lane.b32.xlu2 %v514_v54, %s715_s21 }
0x1158   :  { %v567_v56 = vpop.permute.xlu0 %566 }
0x1159   :  { %v712_v57 = vpop.eup %711  ;;  %590 = vst.msk [vmem:[%s917_s4 + $0x1] sm:$0x1] %vm588_vm6, %v567_v56 }
0x115a   :  { %517 = vrot.lane.b32.xlu1 %v712_v57, %s713_s26 }
0x1160   :  { %v573_v58 = vpop.permute.xlu0 %572 }
0x1161   :  { %593 = vst.msk [vmem:[%s917_s4 + $0x4] sm:$0x1] %vm588_vm6, %v573_v58 }
0x1162   :  { %568 = vrot.lane.b32.xlu1 %v542_v59, %s714_s27 }
0x116a   :  { %574 = vrot.lane.b32.xlu1 %v554_v61, %s714_s27 }
0x11ad   :  { %v605_v63 = vpop.permute.xlu2 %604 }
0x11ae   :  { %607 = vst.msk [vmem:[#allocation3] sm:$0x3] %vm25_vm0, %v605_v63 }
0x11af   :  { %611 = vst.msk [vmem:[%s918_s5] sm:$0x3] %vm25_vm0, %v605_v63 }
0x11cc   :  { %v518_v0 = vpop.permute.xlu1 %517 }
0x11cd   :  { %v520_v1 = vmul.f32 %v518_v0, %v501_v43 }
0x11cf   :  { %v521_v26 = vpack.c.bf16 %v520_v1, %v520_v1  ;;  %598 = vrot.lane.b32.xlu1 %v520_v1, %s714_s27 }
0x11d1   :  { %v530_v2 = vrot.slane %v521_v26, 3 }
0x11d3   :  { %v562_v3 = vsel %vm531_vm2, %v521_v26, %v530_v2 }
0x11d4   :  { %578 = vrot.lane.b32.xlu0 %v562_v3, %s714_s27  ;;  %v569_v50 = vpop.permute.xlu1 %568 }
0x11d5   :  { %591 = vst.msk [vmem:[%s917_s4 + $0x2] sm:$0x1] %vm588_vm6, %v569_v50 }
0x11dc   :  { %v575_v4 = vpop.permute.xlu1 %574 }
0x11dd   :  { %594 = vst.msk [vmem:[%s917_s4 + $0x5] sm:$0x1] %vm588_vm6, %v575_v4 }
0x1241   :  { %v599_v5 = vpop.permute.xlu1 %598 }
0x1242   :  { %602 = vst.msk [vmem:[#allocation2] sm:$0x3] %vm25_vm0, %v599_v5 }
0x1246   :  { %v579_v6 = vpop.permute.xlu0 %578 }
0x1247   :  { %596 = vst.msk [vmem:[%s917_s4 + $0x7] sm:$0x1] %vm588_vm6, %v579_v6 }

</bundles_post_ra>
